<compile_context>
chip_gen: v7x
topology: tpu7x:2x2x1
jax: 0.10.0
libtpu: 0.0.40
codegen_flags: <defaults>
</compile_context>

<pallas_src>
import functools

import jax
import jax.numpy as jnp
from jax import lax
from jax.experimental import pallas as pl
from jax.experimental.pallas import tpu as pltpu

D_IN, D_H1, D_H2, D_OUT = 2, 6, 12, 1

# Flat parameter packing (weights stored transposed as (in_features, out_features),
# flattened row-major, so w[i*out + j] is the weight from input i to output j).
OFF_W1 = 0
OFF_B1 = OFF_W1 + D_IN * D_H1          # 12
OFF_W2 = OFF_B1 + D_H1                 # 18
OFF_B2 = OFF_W2 + D_H1 * D_H2          # 90
OFF_W3 = OFF_B2 + D_H2                 # 102
OFF_B3 = OFF_W3 + D_H2 * D_OUT         # 114
N_PARAMS = OFF_B3 + D_OUT              # 115

LANES = 128
CHUNK_SUBLANES = 8                      # inner chunk = (8, 128) = 1024 elems = 1 vreg/array
CHUNK_ELEMS = CHUNK_SUBLANES * LANES    # 1024


def ffnn_kernel(params_ref, x_ref, o_ref):
    """One batch tile of the forward pass.

    params_ref: f32[N_PARAMS]        in SMEM (scalar reads, hoisted out of the loop).
    x_ref:      f32[D_IN, rows, 128] in VMEM (batch on the sublane x lane plane).
    o_ref:      f32[rows, 128]       in VMEM (lane-dense output -> unmasked stores).
    """
    rows = x_ref.shape[1]
    n_chunks = rows // CHUNK_SUBLANES

    # Hoist all 115 scalar parameter reads above the chunk loop (loop-invariant;
    # JAX does not CSE re-broadcasts inside the loop body).
    w1 = [[params_ref[OFF_W1 + i * D_H1 + j] for j in range(D_H1)] for i in range(D_IN)]
    b1 = [params_ref[OFF_B1 + j] for j in range(D_H1)]
    w2 = [[params_ref[OFF_W2 + i * D_H2 + j] for j in range(D_H2)] for i in range(D_H1)]
    b2 = [params_ref[OFF_B2 + j] for j in range(D_H2)]
    w3 = [params_ref[OFF_W3 + i] for i in range(D_H2)]
    b3 = params_ref[OFF_B3]

    def chunk_body(c, carry):
        r0 = pl.multiple_of(c * CHUNK_SUBLANES, CHUNK_SUBLANES)
        xs = [x_ref[i, pl.ds(r0, CHUNK_SUBLANES), :] for i in range(D_IN)]  # (8,128) each

        # fc1 + ReLU:  h1_j = relu(sum_i x_i * w1[i, j] + b1[j])   (VPU broadcast FMAs)
        h1 = []
        for j in range(D_H1):
            acc = xs[0] * w1[0][j]
            for i in range(1, D_IN):
                acc = acc + xs[i] * w1[i][j]
            h1.append(jnp.maximum(acc + b1[j], 0.0))

        # fc2 + Tanh:  h2_j = tanh(sum_i h1_i * w2[i, j] + b2[j])  (tanh rides the EUP slot)
        h2 = []
        for j in range(D_H2):
            acc = h1[0] * w2[0][j]
            for i in range(1, D_H1):
                acc = acc + h1[i] * w2[i][j]
            h2.append(jnp.tanh(acc + b2[j]))

        # fc3:  y = sum_i h2_i * w3[i] + b3
        y = h2[0] * w3[0]
        for i in range(1, D_H2):
            y = y + h2[i] * w3[i]
        y = y + b3

        o_ref[pl.ds(r0, CHUNK_SUBLANES), :] = y.astype(o_ref.dtype)
        return carry

    lax.fori_loop(0, n_chunks, chunk_body, 0)


def _round_up(n, m):
    return ((n + m - 1) // m) * m


def pack_params(params):
    """Flatten all weights/biases into one f32 vector for SMEM."""
    return jnp.concatenate([
        params["w1"].reshape(-1), params["b1"].reshape(-1),
        params["w2"].reshape(-1), params["b2"].reshape(-1),
        params["w3"].reshape(-1), params["b3"].reshape(-1),
    ]).astype(jnp.float32)


@functools.partial(jax.jit, static_argnames=("batch_tile",))
def ffnn_forward(x, params, *, batch_tile=262144):
    """x: (B, 2) float32 -> (B, 1) float32. Same semantics as the PyTorch module."""
    B = x.shape[0]
    # Per-grid-step tile: multiple of the (8,128) chunk, clamped to the (padded) batch.
    tile = min(_round_up(batch_tile, CHUNK_ELEMS), _round_up(B, CHUNK_ELEMS))
    b_pad = _round_up(B, tile)
    rows_total = b_pad // LANES
    rows_tile = tile // LANES

    # TODO(synk): accept x already laid out as (2, B) (or (2, B//128, 128)) upstream to
    # drop this transpose+pad HBM pass (~10-25% wall clock on v5e/v6e once the kernel
    # itself is efficient).
    x_t = x.astype(jnp.float32).T                       # (2, B): batch on the fast axes
    if b_pad != B:
        x_t = jnp.pad(x_t, ((0, 0), (0, b_pad - B)))    # zero-pad tail tile
    x_t = x_t.reshape(D_IN, rows_total, LANES)

    flat = pack_params(params)                          # f32[115] -> SMEM

    out = pl.pallas_call(
        ffnn_kernel,
        out_shape=jax.ShapeDtypeStruct((rows_total, LANES), jnp.float32),
        grid=(b_pad // tile,),
        in_specs=[
            pl.BlockSpec(memory_space=pltpu.MemorySpace.SMEM),             # packed params
            pl.BlockSpec((D_IN, rows_tile, LANES), lambda i: (0, i, 0)),   # x tile (pipelined)
        ],
        out_specs=pl.BlockSpec((rows_tile, LANES), lambda i: (i, 0)),      # lane-dense out tile
        compiler_params=pltpu.CompilerParams(
            # TODO(synk): on v7x, switch to pltpu.CORE_PARALLEL (or pl.core_map over a
            # tensorcore mesh) so both TensorCores split the batch grid; kept "parallel"
            # here for portability to single-TC v5e/v6e.
            dimension_semantics=("parallel",),
        ),
    )(flat, x_t)

    return out.reshape(b_pad)[:B].reshape(B, 1)


def init_params(key):
    """Deterministic PyTorch-style init: U(-1/sqrt(fan_in), 1/sqrt(fan_in)).
    Weights stored transposed: (in_features, out_features)."""
    dims = [(D_IN, D_H1), (D_H1, D_H2), (D_H2, D_OUT)]
    params = {}
    keys = jax.random.split(key, 2 * len(dims))
    for i, (fin, fout) in enumerate(dims):
        bound = 1.0 / jnp.sqrt(jnp.float32(fin))
        params[f"w{i+1}"] = jax.random.uniform(
            keys[2 * i], (fin, fout), jnp.float32, -bound, bound)
        params[f"b{i+1}"] = jax.random.uniform(
            keys[2 * i + 1], (1, fout), jnp.float32, -bound, bound)
    return params


def ffnn_reference(x, params):
    h1 = jnp.maximum(x @ params["w1"] + params["b1"], 0.0)
    h2 = jnp.tanh(h1 @ params["w2"] + params["b2"])
    return h2 @ params["w3"] + params["b3"]


if __name__ == "__main__":
    key = jax.random.PRNGKey(0)
    k_param, k_x = jax.random.split(key)
    params = init_params(k_param)

    # Small test batch, deliberately not a multiple of the tile: exercises the
    # pad-to-tile path, a 2-step pipelined grid, and the in-kernel chunk loop.
    B = 2500
    x = jax.random.normal(k_x, (B, D_IN), jnp.float32)

    out = ffnn_forward(x, params, batch_tile=2048)
    out = jax.block_until_ready(out)

    ref = ffnn_reference(x, params)
    assert out.shape == (B, 1)
    assert jnp.allclose(out, ref, atol=1e-5, rtol=1e-5), "mismatch vs JAX reference"

    print("KERNEL_OK")
</pallas_src>

<mosaic_0001>
module attributes {stable_mosaic.version = 11 : i64} {
  func.func @ffnn_kernel(%arg0: i32, %arg1: memref<115xf32, #tpu.memory_space<smem>>, %arg2: memref<2x16x128xf32, #tpu.memory_space<vmem>>, %arg3: memref<16x128xf32, #tpu.memory_space<vmem>>) attributes {dimension_semantics = [#tpu.dimension_semantics<parallel>], iteration_bounds = array<i64: 2>, scalar_prefetch = 0 : i64, scratch_operands = 0 : i64, tpu.core_type = #tpu.core_type<tc>, window_params = [{transform_indices = @transform_0, window_bounds = array<i64: 115>}, {transform_indices = @transform_1, window_bounds = array<i64: 2, 16, 128>}, {transform_indices = @transform_2, window_bounds = array<i64: 16, 128>}]} {
    %c0 = arith.constant 0 : index
    %0 = memref.load %arg1[%c0] : memref<115xf32, #tpu.memory_space<smem>>
    %c1 = arith.constant 1 : index
    %1 = memref.load %arg1[%c1] : memref<115xf32, #tpu.memory_space<smem>>
    %c2 = arith.constant 2 : index
    %2 = memref.load %arg1[%c2] : memref<115xf32, #tpu.memory_space<smem>>
    %c3 = arith.constant 3 : index
    %3 = memref.load %arg1[%c3] : memref<115xf32, #tpu.memory_space<smem>>
    %c4 = arith.constant 4 : index
    %4 = memref.load %arg1[%c4] : memref<115xf32, #tpu.memory_space<smem>>
    %c5 = arith.constant 5 : index
    %5 = memref.load %arg1[%c5] : memref<115xf32, #tpu.memory_space<smem>>
    %c6 = arith.constant 6 : index
    %6 = memref.load %arg1[%c6] : memref<115xf32, #tpu.memory_space<smem>>
    %c7 = arith.constant 7 : index
    %7 = memref.load %arg1[%c7] : memref<115xf32, #tpu.memory_space<smem>>
    %c8 = arith.constant 8 : index
    %8 = memref.load %arg1[%c8] : memref<115xf32, #tpu.memory_space<smem>>
    %c9 = arith.constant 9 : index
    %9 = memref.load %arg1[%c9] : memref<115xf32, #tpu.memory_space<smem>>
    %c10 = arith.constant 10 : index
    %10 = memref.load %arg1[%c10] : memref<115xf32, #tpu.memory_space<smem>>
    %c11 = arith.constant 11 : index
    %11 = memref.load %arg1[%c11] : memref<115xf32, #tpu.memory_space<smem>>
    %c12 = arith.constant 12 : index
    %12 = memref.load %arg1[%c12] : memref<115xf32, #tpu.memory_space<smem>>
    %c13 = arith.constant 13 : index
    %13 = memref.load %arg1[%c13] : memref<115xf32, #tpu.memory_space<smem>>
    %c14 = arith.constant 14 : index
    %14 = memref.load %arg1[%c14] : memref<115xf32, #tpu.memory_space<smem>>
    %c15 = arith.constant 15 : index
    %15 = memref.load %arg1[%c15] : memref<115xf32, #tpu.memory_space<smem>>
    %c16 = arith.constant 16 : index
    %16 = memref.load %arg1[%c16] : memref<115xf32, #tpu.memory_space<smem>>
    %c17 = arith.constant 17 : index
    %17 = memref.load %arg1[%c17] : memref<115xf32, #tpu.memory_space<smem>>
    %c18 = arith.constant 18 : index
    %18 = memref.load %arg1[%c18] : memref<115xf32, #tpu.memory_space<smem>>
    %c19 = arith.constant 19 : index
    %19 = memref.load %arg1[%c19] : memref<115xf32, #tpu.memory_space<smem>>
    %c20 = arith.constant 20 : index
    %20 = memref.load %arg1[%c20] : memref<115xf32, #tpu.memory_space<smem>>
    %c21 = arith.constant 21 : index
    %21 = memref.load %arg1[%c21] : memref<115xf32, #tpu.memory_space<smem>>
    %c22 = arith.constant 22 : index
    %22 = memref.load %arg1[%c22] : memref<115xf32, #tpu.memory_space<smem>>
    %c23 = arith.constant 23 : index
    %23 = memref.load %arg1[%c23] : memref<115xf32, #tpu.memory_space<smem>>
    %c24 = arith.constant 24 : index
    %24 = memref.load %arg1[%c24] : memref<115xf32, #tpu.memory_space<smem>>
    %c25 = arith.constant 25 : index
    %25 = memref.load %arg1[%c25] : memref<115xf32, #tpu.memory_space<smem>>
    %c26 = arith.constant 26 : index
    %26 = memref.load %arg1[%c26] : memref<115xf32, #tpu.memory_space<smem>>
    %c27 = arith.constant 27 : index
    %27 = memref.load %arg1[%c27] : memref<115xf32, #tpu.memory_space<smem>>
    %c28 = arith.constant 28 : index
    %28 = memref.load %arg1[%c28] : memref<115xf32, #tpu.memory_space<smem>>
    %c29 = arith.constant 29 : index
    %29 = memref.load %arg1[%c29] : memref<115xf32, #tpu.memory_space<smem>>
    %c30 = arith.constant 30 : index
    %30 = memref.load %arg1[%c30] : memref<115xf32, #tpu.memory_space<smem>>
    %c31 = arith.constant 31 : index
    %31 = memref.load %arg1[%c31] : memref<115xf32, #tpu.memory_space<smem>>
    %c32 = arith.constant 32 : index
    %32 = memref.load %arg1[%c32] : memref<115xf32, #tpu.memory_space<smem>>
    %c33 = arith.constant 33 : index
    %33 = memref.load %arg1[%c33] : memref<115xf32, #tpu.memory_space<smem>>
    %c34 = arith.constant 34 : index
    %34 = memref.load %arg1[%c34] : memref<115xf32, #tpu.memory_space<smem>>
    %c35 = arith.constant 35 : index
    %35 = memref.load %arg1[%c35] : memref<115xf32, #tpu.memory_space<smem>>
    %c36 = arith.constant 36 : index
    %36 = memref.load %arg1[%c36] : memref<115xf32, #tpu.memory_space<smem>>
    %c37 = arith.constant 37 : index
    %37 = memref.load %arg1[%c37] : memref<115xf32, #tpu.memory_space<smem>>
    %c38 = arith.constant 38 : index
    %38 = memref.load %arg1[%c38] : memref<115xf32, #tpu.memory_space<smem>>
    %c39 = arith.constant 39 : index
    %39 = memref.load %arg1[%c39] : memref<115xf32, #tpu.memory_space<smem>>
    %c40 = arith.constant 40 : index
    %40 = memref.load %arg1[%c40] : memref<115xf32, #tpu.memory_space<smem>>
    %c41 = arith.constant 41 : index
    %41 = memref.load %arg1[%c41] : memref<115xf32, #tpu.memory_space<smem>>
    %c42 = arith.constant 42 : index
    %42 = memref.load %arg1[%c42] : memref<115xf32, #tpu.memory_space<smem>>
    %c43 = arith.constant 43 : index
    %43 = memref.load %arg1[%c43] : memref<115xf32, #tpu.memory_space<smem>>
    %c44 = arith.constant 44 : index
    %44 = memref.load %arg1[%c44] : memref<115xf32, #tpu.memory_space<smem>>
    %c45 = arith.constant 45 : index
    %45 = memref.load %arg1[%c45] : memref<115xf32, #tpu.memory_space<smem>>
    %c46 = arith.constant 46 : index
    %46 = memref.load %arg1[%c46] : memref<115xf32, #tpu.memory_space<smem>>
    %c47 = arith.constant 47 : index
    %47 = memref.load %arg1[%c47] : memref<115xf32, #tpu.memory_space<smem>>
    %c48 = arith.constant 48 : index
    %48 = memref.load %arg1[%c48] : memref<115xf32, #tpu.memory_space<smem>>
    %c49 = arith.constant 49 : index
    %49 = memref.load %arg1[%c49] : memref<115xf32, #tpu.memory_space<smem>>
    %c50 = arith.constant 50 : index
    %50 = memref.load %arg1[%c50] : memref<115xf32, #tpu.memory_space<smem>>
    %c51 = arith.constant 51 : index
    %51 = memref.load %arg1[%c51] : memref<115xf32, #tpu.memory_space<smem>>
    %c52 = arith.constant 52 : index
    %52 = memref.load %arg1[%c52] : memref<115xf32, #tpu.memory_space<smem>>
    %c53 = arith.constant 53 : index
    %53 = memref.load %arg1[%c53] : memref<115xf32, #tpu.memory_space<smem>>
    %c54 = arith.constant 54 : index
    %54 = memref.load %arg1[%c54] : memref<115xf32, #tpu.memory_space<smem>>
    %c55 = arith.constant 55 : index
    %55 = memref.load %arg1[%c55] : memref<115xf32, #tpu.memory_space<smem>>
    %c56 = arith.constant 56 : index
    %56 = memref.load %arg1[%c56] : memref<115xf32, #tpu.memory_space<smem>>
    %c57 = arith.constant 57 : index
    %57 = memref.load %arg1[%c57] : memref<115xf32, #tpu.memory_space<smem>>
    %c58 = arith.constant 58 : index
    %58 = memref.load %arg1[%c58] : memref<115xf32, #tpu.memory_space<smem>>
    %c59 = arith.constant 59 : index
    %59 = memref.load %arg1[%c59] : memref<115xf32, #tpu.memory_space<smem>>
    %c60 = arith.constant 60 : index
    %60 = memref.load %arg1[%c60] : memref<115xf32, #tpu.memory_space<smem>>
    %c61 = arith.constant 61 : index
    %61 = memref.load %arg1[%c61] : memref<115xf32, #tpu.memory_space<smem>>
    %c62 = arith.constant 62 : index
    %62 = memref.load %arg1[%c62] : memref<115xf32, #tpu.memory_space<smem>>
    %c63 = arith.constant 63 : index
    %63 = memref.load %arg1[%c63] : memref<115xf32, #tpu.memory_space<smem>>
    %c64 = arith.constant 64 : index
    %64 = memref.load %arg1[%c64] : memref<115xf32, #tpu.memory_space<smem>>
    %c65 = arith.constant 65 : index
    %65 = memref.load %arg1[%c65] : memref<115xf32, #tpu.memory_space<smem>>
    %c66 = arith.constant 66 : index
    %66 = memref.load %arg1[%c66] : memref<115xf32, #tpu.memory_space<smem>>
    %c67 = arith.constant 67 : index
    %67 = memref.load %arg1[%c67] : memref<115xf32, #tpu.memory_space<smem>>
    %c68 = arith.constant 68 : index
    %68 = memref.load %arg1[%c68] : memref<115xf32, #tpu.memory_space<smem>>
    %c69 = arith.constant 69 : index
    %69 = memref.load %arg1[%c69] : memref<115xf32, #tpu.memory_space<smem>>
    %c70 = arith.constant 70 : index
    %70 = memref.load %arg1[%c70] : memref<115xf32, #tpu.memory_space<smem>>
    %c71 = arith.constant 71 : index
    %71 = memref.load %arg1[%c71] : memref<115xf32, #tpu.memory_space<smem>>
    %c72 = arith.constant 72 : index
    %72 = memref.load %arg1[%c72] : memref<115xf32, #tpu.memory_space<smem>>
    %c73 = arith.constant 73 : index
    %73 = memref.load %arg1[%c73] : memref<115xf32, #tpu.memory_space<smem>>
    %c74 = arith.constant 74 : index
    %74 = memref.load %arg1[%c74] : memref<115xf32, #tpu.memory_space<smem>>
    %c75 = arith.constant 75 : index
    %75 = memref.load %arg1[%c75] : memref<115xf32, #tpu.memory_space<smem>>
    %c76 = arith.constant 76 : index
    %76 = memref.load %arg1[%c76] : memref<115xf32, #tpu.memory_space<smem>>
    %c77 = arith.constant 77 : index
    %77 = memref.load %arg1[%c77] : memref<115xf32, #tpu.memory_space<smem>>
    %c78 = arith.constant 78 : index
    %78 = memref.load %arg1[%c78] : memref<115xf32, #tpu.memory_space<smem>>
    %c79 = arith.constant 79 : index
    %79 = memref.load %arg1[%c79] : memref<115xf32, #tpu.memory_space<smem>>
    %c80 = arith.constant 80 : index
    %80 = memref.load %arg1[%c80] : memref<115xf32, #tpu.memory_space<smem>>
    %c81 = arith.constant 81 : index
    %81 = memref.load %arg1[%c81] : memref<115xf32, #tpu.memory_space<smem>>
    %c82 = arith.constant 82 : index
    %82 = memref.load %arg1[%c82] : memref<115xf32, #tpu.memory_space<smem>>
    %c83 = arith.constant 83 : index
    %83 = memref.load %arg1[%c83] : memref<115xf32, #tpu.memory_space<smem>>
    %c84 = arith.constant 84 : index
    %84 = memref.load %arg1[%c84] : memref<115xf32, #tpu.memory_space<smem>>
    %c85 = arith.constant 85 : index
    %85 = memref.load %arg1[%c85] : memref<115xf32, #tpu.memory_space<smem>>
    %c86 = arith.constant 86 : index
    %86 = memref.load %arg1[%c86] : memref<115xf32, #tpu.memory_space<smem>>
    %c87 = arith.constant 87 : index
    %87 = memref.load %arg1[%c87] : memref<115xf32, #tpu.memory_space<smem>>
    %c88 = arith.constant 88 : index
    %88 = memref.load %arg1[%c88] : memref<115xf32, #tpu.memory_space<smem>>
    %c89 = arith.constant 89 : index
    %89 = memref.load %arg1[%c89] : memref<115xf32, #tpu.memory_space<smem>>
    %c90 = arith.constant 90 : index
    %90 = memref.load %arg1[%c90] : memref<115xf32, #tpu.memory_space<smem>>
    %c91 = arith.constant 91 : index
    %91 = memref.load %arg1[%c91] : memref<115xf32, #tpu.memory_space<smem>>
    %c92 = arith.constant 92 : index
    %92 = memref.load %arg1[%c92] : memref<115xf32, #tpu.memory_space<smem>>
    %c93 = arith.constant 93 : index
    %93 = memref.load %arg1[%c93] : memref<115xf32, #tpu.memory_space<smem>>
    %c94 = arith.constant 94 : index
    %94 = memref.load %arg1[%c94] : memref<115xf32, #tpu.memory_space<smem>>
    %c95 = arith.constant 95 : index
    %95 = memref.load %arg1[%c95] : memref<115xf32, #tpu.memory_space<smem>>
    %c96 = arith.constant 96 : index
    %96 = memref.load %arg1[%c96] : memref<115xf32, #tpu.memory_space<smem>>
    %c97 = arith.constant 97 : index
    %97 = memref.load %arg1[%c97] : memref<115xf32, #tpu.memory_space<smem>>
    %c98 = arith.constant 98 : index
    %98 = memref.load %arg1[%c98] : memref<115xf32, #tpu.memory_space<smem>>
    %c99 = arith.constant 99 : index
    %99 = memref.load %arg1[%c99] : memref<115xf32, #tpu.memory_space<smem>>
    %c100 = arith.constant 100 : index
    %100 = memref.load %arg1[%c100] : memref<115xf32, #tpu.memory_space<smem>>
    %c101 = arith.constant 101 : index
    %101 = memref.load %arg1[%c101] : memref<115xf32, #tpu.memory_space<smem>>
    %c102 = arith.constant 102 : index
    %102 = memref.load %arg1[%c102] : memref<115xf32, #tpu.memory_space<smem>>
    %c103 = arith.constant 103 : index
    %103 = memref.load %arg1[%c103] : memref<115xf32, #tpu.memory_space<smem>>
    %c104 = arith.constant 104 : index
    %104 = memref.load %arg1[%c104] : memref<115xf32, #tpu.memory_space<smem>>
    %c105 = arith.constant 105 : index
    %105 = memref.load %arg1[%c105] : memref<115xf32, #tpu.memory_space<smem>>
    %c106 = arith.constant 106 : index
    %106 = memref.load %arg1[%c106] : memref<115xf32, #tpu.memory_space<smem>>
    %c107 = arith.constant 107 : index
    %107 = memref.load %arg1[%c107] : memref<115xf32, #tpu.memory_space<smem>>
    %c108 = arith.constant 108 : index
    %108 = memref.load %arg1[%c108] : memref<115xf32, #tpu.memory_space<smem>>
    %c109 = arith.constant 109 : index
    %109 = memref.load %arg1[%c109] : memref<115xf32, #tpu.memory_space<smem>>
    %c110 = arith.constant 110 : index
    %110 = memref.load %arg1[%c110] : memref<115xf32, #tpu.memory_space<smem>>
    %c111 = arith.constant 111 : index
    %111 = memref.load %arg1[%c111] : memref<115xf32, #tpu.memory_space<smem>>
    %c112 = arith.constant 112 : index
    %112 = memref.load %arg1[%c112] : memref<115xf32, #tpu.memory_space<smem>>
    %c113 = arith.constant 113 : index
    %113 = memref.load %arg1[%c113] : memref<115xf32, #tpu.memory_space<smem>>
    %c114 = arith.constant 114 : index
    %114 = memref.load %arg1[%c114] : memref<115xf32, #tpu.memory_space<smem>>
    %c0_i32 = arith.constant 0 : i32
    %c2_i32 = arith.constant 2 : i32
    %115 = arith.addi %c0_i32, %c2_i32 : i32
    %c1_i32 = arith.constant 1 : i32
    scf.for %arg4 = %c0_i32 to %115 step %c1_i32  : i32 {
      %c8_i32 = arith.constant 8 : i32
      %116 = arith.muli %arg4, %c8_i32 : i32
      %117 = tpu.assume_multiple %116, 8 : i32
      %c0_1 = arith.constant 0 : index
      %118 = arith.index_cast %117 : i32 to index
      %c0_2 = arith.constant 0 : index
      %119 = vector.load %arg2[%c0_1, %118, %c0_2] : memref<2x16x128xf32, #tpu.memory_space<vmem>>, vector<1x8x128xf32>
      %120 = vector.shape_cast %119 : vector<1x8x128xf32> to vector<8x128xf32>
      %c1_3 = arith.constant 1 : index
      %121 = arith.index_cast %117 : i32 to index
      %c0_4 = arith.constant 0 : index
      %122 = vector.load %arg2[%c1_3, %121, %c0_4] : memref<2x16x128xf32, #tpu.memory_space<vmem>>, vector<1x8x128xf32>
      %123 = vector.shape_cast %122 : vector<1x8x128xf32> to vector<8x128xf32>
      %124 = vector.broadcast %0 : f32 to vector<8x128xf32>
      %125 = arith.mulf %120, %124 : vector<8x128xf32>
      %126 = vector.broadcast %6 : f32 to vector<8x128xf32>
      %127 = arith.mulf %123, %126 : vector<8x128xf32>
      %128 = arith.addf %125, %127 : vector<8x128xf32>
      %129 = vector.broadcast %12 : f32 to vector<8x128xf32>
      %130 = arith.addf %128, %129 : vector<8x128xf32>
      %cst = arith.constant 0.000000e+00 : f32
      %131 = vector.broadcast %cst : f32 to vector<8x128xf32>
      %132 = arith.maximumf %130, %131 : vector<8x128xf32>
      %133 = vector.broadcast %1 : f32 to vector<8x128xf32>
      %134 = arith.mulf %120, %133 : vector<8x128xf32>
      %135 = vector.broadcast %7 : f32 to vector<8x128xf32>
      %136 = arith.mulf %123, %135 : vector<8x128xf32>
      %137 = arith.addf %134, %136 : vector<8x128xf32>
      %138 = vector.broadcast %13 : f32 to vector<8x128xf32>
      %139 = arith.addf %137, %138 : vector<8x128xf32>
      %cst_5 = arith.constant 0.000000e+00 : f32
      %140 = vector.broadcast %cst_5 : f32 to vector<8x128xf32>
      %141 = arith.maximumf %139, %140 : vector<8x128xf32>
      %142 = vector.broadcast %2 : f32 to vector<8x128xf32>
      %143 = arith.mulf %120, %142 : vector<8x128xf32>
      %144 = vector.broadcast %8 : f32 to vector<8x128xf32>
      %145 = arith.mulf %123, %144 : vector<8x128xf32>
      %146 = arith.addf %143, %145 : vector<8x128xf32>
      %147 = vector.broadcast %14 : f32 to vector<8x128xf32>
      %148 = arith.addf %146, %147 : vector<8x128xf32>
      %cst_6 = arith.constant 0.000000e+00 : f32
      %149 = vector.broadcast %cst_6 : f32 to vector<8x128xf32>
      %150 = arith.maximumf %148, %149 : vector<8x128xf32>
      %151 = vector.broadcast %3 : f32 to vector<8x128xf32>
      %152 = arith.mulf %120, %151 : vector<8x128xf32>
      %153 = vector.broadcast %9 : f32 to vector<8x128xf32>
      %154 = arith.mulf %123, %153 : vector<8x128xf32>
      %155 = arith.addf %152, %154 : vector<8x128xf32>
      %156 = vector.broadcast %15 : f32 to vector<8x128xf32>
      %157 = arith.addf %155, %156 : vector<8x128xf32>
      %cst_7 = arith.constant 0.000000e+00 : f32
      %158 = vector.broadcast %cst_7 : f32 to vector<8x128xf32>
      %159 = arith.maximumf %157, %158 : vector<8x128xf32>
      %160 = vector.broadcast %4 : f32 to vector<8x128xf32>
      %161 = arith.mulf %120, %160 : vector<8x128xf32>
      %162 = vector.broadcast %10 : f32 to vector<8x128xf32>
      %163 = arith.mulf %123, %162 : vector<8x128xf32>
      %164 = arith.addf %161, %163 : vector<8x128xf32>
      %165 = vector.broadcast %16 : f32 to vector<8x128xf32>
      %166 = arith.addf %164, %165 : vector<8x128xf32>
      %cst_8 = arith.constant 0.000000e+00 : f32
      %167 = vector.broadcast %cst_8 : f32 to vector<8x128xf32>
      %168 = arith.maximumf %166, %167 : vector<8x128xf32>
      %169 = vector.broadcast %5 : f32 to vector<8x128xf32>
      %170 = arith.mulf %120, %169 : vector<8x128xf32>
      %171 = vector.broadcast %11 : f32 to vector<8x128xf32>
      %172 = arith.mulf %123, %171 : vector<8x128xf32>
      %173 = arith.addf %170, %172 : vector<8x128xf32>
      %174 = vector.broadcast %17 : f32 to vector<8x128xf32>
      %175 = arith.addf %173, %174 : vector<8x128xf32>
      %cst_9 = arith.constant 0.000000e+00 : f32
      %176 = vector.broadcast %cst_9 : f32 to vector<8x128xf32>
      %177 = arith.maximumf %175, %176 : vector<8x128xf32>
      %178 = vector.broadcast %18 : f32 to vector<8x128xf32>
      %179 = arith.mulf %132, %178 : vector<8x128xf32>
      %180 = vector.broadcast %30 : f32 to vector<8x128xf32>
      %181 = arith.mulf %141, %180 : vector<8x128xf32>
      %182 = arith.addf %179, %181 : vector<8x128xf32>
      %183 = vector.broadcast %42 : f32 to vector<8x128xf32>
      %184 = arith.mulf %150, %183 : vector<8x128xf32>
      %185 = arith.addf %182, %184 : vector<8x128xf32>
      %186 = vector.broadcast %54 : f32 to vector<8x128xf32>
      %187 = arith.mulf %159, %186 : vector<8x128xf32>
      %188 = arith.addf %185, %187 : vector<8x128xf32>
      %189 = vector.broadcast %66 : f32 to vector<8x128xf32>
      %190 = arith.mulf %168, %189 : vector<8x128xf32>
      %191 = arith.addf %188, %190 : vector<8x128xf32>
      %192 = vector.broadcast %78 : f32 to vector<8x128xf32>
      %193 = arith.mulf %177, %192 : vector<8x128xf32>
      %194 = arith.addf %191, %193 : vector<8x128xf32>
      %195 = vector.broadcast %90 : f32 to vector<8x128xf32>
      %196 = arith.addf %194, %195 : vector<8x128xf32>
      %197 = math.tanh %196 : vector<8x128xf32>
      %198 = vector.broadcast %19 : f32 to vector<8x128xf32>
      %199 = arith.mulf %132, %198 : vector<8x128xf32>
      %200 = vector.broadcast %31 : f32 to vector<8x128xf32>
      %201 = arith.mulf %141, %200 : vector<8x128xf32>
      %202 = arith.addf %199, %201 : vector<8x128xf32>
      %203 = vector.broadcast %43 : f32 to vector<8x128xf32>
      %204 = arith.mulf %150, %203 : vector<8x128xf32>
      %205 = arith.addf %202, %204 : vector<8x128xf32>
      %206 = vector.broadcast %55 : f32 to vector<8x128xf32>
      %207 = arith.mulf %159, %206 : vector<8x128xf32>
      %208 = arith.addf %205, %207 : vector<8x128xf32>
      %209 = vector.broadcast %67 : f32 to vector<8x128xf32>
      %210 = arith.mulf %168, %209 : vector<8x128xf32>
      %211 = arith.addf %208, %210 : vector<8x128xf32>
      %212 = vector.broadcast %79 : f32 to vector<8x128xf32>
      %213 = arith.mulf %177, %212 : vector<8x128xf32>
      %214 = arith.addf %211, %213 : vector<8x128xf32>
      %215 = vector.broadcast %91 : f32 to vector<8x128xf32>
      %216 = arith.addf %214, %215 : vector<8x128xf32>
      %217 = math.tanh %216 : vector<8x128xf32>
      %218 = vector.broadcast %20 : f32 to vector<8x128xf32>
      %219 = arith.mulf %132, %218 : vector<8x128xf32>
      %220 = vector.broadcast %32 : f32 to vector<8x128xf32>
      %221 = arith.mulf %141, %220 : vector<8x128xf32>
      %222 = arith.addf %219, %221 : vector<8x128xf32>
      %223 = vector.broadcast %44 : f32 to vector<8x128xf32>
      %224 = arith.mulf %150, %223 : vector<8x128xf32>
      %225 = arith.addf %222, %224 : vector<8x128xf32>
      %226 = vector.broadcast %56 : f32 to vector<8x128xf32>
      %227 = arith.mulf %159, %226 : vector<8x128xf32>
      %228 = arith.addf %225, %227 : vector<8x128xf32>
      %229 = vector.broadcast %68 : f32 to vector<8x128xf32>
      %230 = arith.mulf %168, %229 : vector<8x128xf32>
      %231 = arith.addf %228, %230 : vector<8x128xf32>
      %232 = vector.broadcast %80 : f32 to vector<8x128xf32>
      %233 = arith.mulf %177, %232 : vector<8x128xf32>
      %234 = arith.addf %231, %233 : vector<8x128xf32>
      %235 = vector.broadcast %92 : f32 to vector<8x128xf32>
      %236 = arith.addf %234, %235 : vector<8x128xf32>
      %237 = math.tanh %236 : vector<8x128xf32>
      %238 = vector.broadcast %21 : f32 to vector<8x128xf32>
      %239 = arith.mulf %132, %238 : vector<8x128xf32>
      %240 = vector.broadcast %33 : f32 to vector<8x128xf32>
      %241 = arith.mulf %141, %240 : vector<8x128xf32>
      %242 = arith.addf %239, %241 : vector<8x128xf32>
      %243 = vector.broadcast %45 : f32 to vector<8x128xf32>
      %244 = arith.mulf %150, %243 : vector<8x128xf32>
      %245 = arith.addf %242, %244 : vector<8x128xf32>
      %246 = vector.broadcast %57 : f32 to vector<8x128xf32>
      %247 = arith.mulf %159, %246 : vector<8x128xf32>
      %248 = arith.addf %245, %247 : vector<8x128xf32>
      %249 = vector.broadcast %69 : f32 to vector<8x128xf32>
      %250 = arith.mulf %168, %249 : vector<8x128xf32>
      %251 = arith.addf %248, %250 : vector<8x128xf32>
      %252 = vector.broadcast %81 : f32 to vector<8x128xf32>
      %253 = arith.mulf %177, %252 : vector<8x128xf32>
      %254 = arith.addf %251, %253 : vector<8x128xf32>
      %255 = vector.broadcast %93 : f32 to vector<8x128xf32>
      %256 = arith.addf %254, %255 : vector<8x128xf32>
      %257 = math.tanh %256 : vector<8x128xf32>
      %258 = vector.broadcast %22 : f32 to vector<8x128xf32>
      %259 = arith.mulf %132, %258 : vector<8x128xf32>
      %260 = vector.broadcast %34 : f32 to vector<8x128xf32>
      %261 = arith.mulf %141, %260 : vector<8x128xf32>
      %262 = arith.addf %259, %261 : vector<8x128xf32>
      %263 = vector.broadcast %46 : f32 to vector<8x128xf32>
      %264 = arith.mulf %150, %263 : vector<8x128xf32>
      %265 = arith.addf %262, %264 : vector<8x128xf32>
      %266 = vector.broadcast %58 : f32 to vector<8x128xf32>
      %267 = arith.mulf %159, %266 : vector<8x128xf32>
      %268 = arith.addf %265, %267 : vector<8x128xf32>
      %269 = vector.broadcast %70 : f32 to vector<8x128xf32>
      %270 = arith.mulf %168, %269 : vector<8x128xf32>
      %271 = arith.addf %268, %270 : vector<8x128xf32>
      %272 = vector.broadcast %82 : f32 to vector<8x128xf32>
      %273 = arith.mulf %177, %272 : vector<8x128xf32>
      %274 = arith.addf %271, %273 : vector<8x128xf32>
      %275 = vector.broadcast %94 : f32 to vector<8x128xf32>
      %276 = arith.addf %274, %275 : vector<8x128xf32>
      %277 = math.tanh %276 : vector<8x128xf32>
      %278 = vector.broadcast %23 : f32 to vector<8x128xf32>
      %279 = arith.mulf %132, %278 : vector<8x128xf32>
      %280 = vector.broadcast %35 : f32 to vector<8x128xf32>
      %281 = arith.mulf %141, %280 : vector<8x128xf32>
      %282 = arith.addf %279, %281 : vector<8x128xf32>
      %283 = vector.broadcast %47 : f32 to vector<8x128xf32>
      %284 = arith.mulf %150, %283 : vector<8x128xf32>
      %285 = arith.addf %282, %284 : vector<8x128xf32>
      %286 = vector.broadcast %59 : f32 to vector<8x128xf32>
      %287 = arith.mulf %159, %286 : vector<8x128xf32>
      %288 = arith.addf %285, %287 : vector<8x128xf32>
      %289 = vector.broadcast %71 : f32 to vector<8x128xf32>
      %290 = arith.mulf %168, %289 : vector<8x128xf32>
      %291 = arith.addf %288, %290 : vector<8x128xf32>
      %292 = vector.broadcast %83 : f32 to vector<8x128xf32>
      %293 = arith.mulf %177, %292 : vector<8x128xf32>
      %294 = arith.addf %291, %293 : vector<8x128xf32>
      %295 = vector.broadcast %95 : f32 to vector<8x128xf32>
      %296 = arith.addf %294, %295 : vector<8x128xf32>
      %297 = math.tanh %296 : vector<8x128xf32>
      %298 = vector.broadcast %24 : f32 to vector<8x128xf32>
      %299 = arith.mulf %132, %298 : vector<8x128xf32>
      %300 = vector.broadcast %36 : f32 to vector<8x128xf32>
      %301 = arith.mulf %141, %300 : vector<8x128xf32>
      %302 = arith.addf %299, %301 : vector<8x128xf32>
      %303 = vector.broadcast %48 : f32 to vector<8x128xf32>
      %304 = arith.mulf %150, %303 : vector<8x128xf32>
      %305 = arith.addf %302, %304 : vector<8x128xf32>
      %306 = vector.broadcast %60 : f32 to vector<8x128xf32>
      %307 = arith.mulf %159, %306 : vector<8x128xf32>
      %308 = arith.addf %305, %307 : vector<8x128xf32>
      %309 = vector.broadcast %72 : f32 to vector<8x128xf32>
      %310 = arith.mulf %168, %309 : vector<8x128xf32>
      %311 = arith.addf %308, %310 : vector<8x128xf32>
      %312 = vector.broadcast %84 : f32 to vector<8x128xf32>
      %313 = arith.mulf %177, %312 : vector<8x128xf32>
      %314 = arith.addf %311, %313 : vector<8x128xf32>
      %315 = vector.broadcast %96 : f32 to vector<8x128xf32>
      %316 = arith.addf %314, %315 : vector<8x128xf32>
      %317 = math.tanh %316 : vector<8x128xf32>
      %318 = vector.broadcast %25 : f32 to vector<8x128xf32>
      %319 = arith.mulf %132, %318 : vector<8x128xf32>
      %320 = vector.broadcast %37 : f32 to vector<8x128xf32>
      %321 = arith.mulf %141, %320 : vector<8x128xf32>
      %322 = arith.addf %319, %321 : vector<8x128xf32>
      %323 = vector.broadcast %49 : f32 to vector<8x128xf32>
      %324 = arith.mulf %150, %323 : vector<8x128xf32>
      %325 = arith.addf %322, %324 : vector<8x128xf32>
      %326 = vector.broadcast %61 : f32 to vector<8x128xf32>
      %327 = arith.mulf %159, %326 : vector<8x128xf32>
      %328 = arith.addf %325, %327 : vector<8x128xf32>
      %329 = vector.broadcast %73 : f32 to vector<8x128xf32>
      %330 = arith.mulf %168, %329 : vector<8x128xf32>
      %331 = arith.addf %328, %330 : vector<8x128xf32>
      %332 = vector.broadcast %85 : f32 to vector<8x128xf32>
      %333 = arith.mulf %177, %332 : vector<8x128xf32>
      %334 = arith.addf %331, %333 : vector<8x128xf32>
      %335 = vector.broadcast %97 : f32 to vector<8x128xf32>
      %336 = arith.addf %334, %335 : vector<8x128xf32>
      %337 = math.tanh %336 : vector<8x128xf32>
      %338 = vector.broadcast %26 : f32 to vector<8x128xf32>
      %339 = arith.mulf %132, %338 : vector<8x128xf32>
      %340 = vector.broadcast %38 : f32 to vector<8x128xf32>
      %341 = arith.mulf %141, %340 : vector<8x128xf32>
      %342 = arith.addf %339, %341 : vector<8x128xf32>
      %343 = vector.broadcast %50 : f32 to vector<8x128xf32>
      %344 = arith.mulf %150, %343 : vector<8x128xf32>
      %345 = arith.addf %342, %344 : vector<8x128xf32>
      %346 = vector.broadcast %62 : f32 to vector<8x128xf32>
      %347 = arith.mulf %159, %346 : vector<8x128xf32>
      %348 = arith.addf %345, %347 : vector<8x128xf32>
      %349 = vector.broadcast %74 : f32 to vector<8x128xf32>
      %350 = arith.mulf %168, %349 : vector<8x128xf32>
      %351 = arith.addf %348, %350 : vector<8x128xf32>
      %352 = vector.broadcast %86 : f32 to vector<8x128xf32>
      %353 = arith.mulf %177, %352 : vector<8x128xf32>
      %354 = arith.addf %351, %353 : vector<8x128xf32>
      %355 = vector.broadcast %98 : f32 to vector<8x128xf32>
      %356 = arith.addf %354, %355 : vector<8x128xf32>
      %357 = math.tanh %356 : vector<8x128xf32>
      %358 = vector.broadcast %27 : f32 to vector<8x128xf32>
      %359 = arith.mulf %132, %358 : vector<8x128xf32>
      %360 = vector.broadcast %39 : f32 to vector<8x128xf32>
      %361 = arith.mulf %141, %360 : vector<8x128xf32>
      %362 = arith.addf %359, %361 : vector<8x128xf32>
      %363 = vector.broadcast %51 : f32 to vector<8x128xf32>
      %364 = arith.mulf %150, %363 : vector<8x128xf32>
      %365 = arith.addf %362, %364 : vector<8x128xf32>
      %366 = vector.broadcast %63 : f32 to vector<8x128xf32>
      %367 = arith.mulf %159, %366 : vector<8x128xf32>
      %368 = arith.addf %365, %367 : vector<8x128xf32>
      %369 = vector.broadcast %75 : f32 to vector<8x128xf32>
      %370 = arith.mulf %168, %369 : vector<8x128xf32>
      %371 = arith.addf %368, %370 : vector<8x128xf32>
      %372 = vector.broadcast %87 : f32 to vector<8x128xf32>
      %373 = arith.mulf %177, %372 : vector<8x128xf32>
      %374 = arith.addf %371, %373 : vector<8x128xf32>
      %375 = vector.broadcast %99 : f32 to vector<8x128xf32>
      %376 = arith.addf %374, %375 : vector<8x128xf32>
      %377 = math.tanh %376 : vector<8x128xf32>
      %378 = vector.broadcast %28 : f32 to vector<8x128xf32>
      %379 = arith.mulf %132, %378 : vector<8x128xf32>
      %380 = vector.broadcast %40 : f32 to vector<8x128xf32>
      %381 = arith.mulf %141, %380 : vector<8x128xf32>
      %382 = arith.addf %379, %381 : vector<8x128xf32>
      %383 = vector.broadcast %52 : f32 to vector<8x128xf32>
      %384 = arith.mulf %150, %383 : vector<8x128xf32>
      %385 = arith.addf %382, %384 : vector<8x128xf32>
      %386 = vector.broadcast %64 : f32 to vector<8x128xf32>
      %387 = arith.mulf %159, %386 : vector<8x128xf32>
      %388 = arith.addf %385, %387 : vector<8x128xf32>
      %389 = vector.broadcast %76 : f32 to vector<8x128xf32>
      %390 = arith.mulf %168, %389 : vector<8x128xf32>
      %391 = arith.addf %388, %390 : vector<8x128xf32>
      %392 = vector.broadcast %88 : f32 to vector<8x128xf32>
      %393 = arith.mulf %177, %392 : vector<8x128xf32>
      %394 = arith.addf %391, %393 : vector<8x128xf32>
      %395 = vector.broadcast %100 : f32 to vector<8x128xf32>
      %396 = arith.addf %394, %395 : vector<8x128xf32>
      %397 = math.tanh %396 : vector<8x128xf32>
      %398 = vector.broadcast %29 : f32 to vector<8x128xf32>
      %399 = arith.mulf %132, %398 : vector<8x128xf32>
      %400 = vector.broadcast %41 : f32 to vector<8x128xf32>
      %401 = arith.mulf %141, %400 : vector<8x128xf32>
      %402 = arith.addf %399, %401 : vector<8x128xf32>
      %403 = vector.broadcast %53 : f32 to vector<8x128xf32>
      %404 = arith.mulf %150, %403 : vector<8x128xf32>
      %405 = arith.addf %402, %404 : vector<8x128xf32>
      %406 = vector.broadcast %65 : f32 to vector<8x128xf32>
      %407 = arith.mulf %159, %406 : vector<8x128xf32>
      %408 = arith.addf %405, %407 : vector<8x128xf32>
      %409 = vector.broadcast %77 : f32 to vector<8x128xf32>
      %410 = arith.mulf %168, %409 : vector<8x128xf32>
      %411 = arith.addf %408, %410 : vector<8x128xf32>
      %412 = vector.broadcast %89 : f32 to vector<8x128xf32>
      %413 = arith.mulf %177, %412 : vector<8x128xf32>
      %414 = arith.addf %411, %413 : vector<8x128xf32>
      %415 = vector.broadcast %101 : f32 to vector<8x128xf32>
      %416 = arith.addf %414, %415 : vector<8x128xf32>
      %417 = math.tanh %416 : vector<8x128xf32>
      %418 = vector.broadcast %102 : f32 to vector<8x128xf32>
      %419 = arith.mulf %197, %418 : vector<8x128xf32>
      %420 = vector.broadcast %103 : f32 to vector<8x128xf32>
      %421 = arith.mulf %217, %420 : vector<8x128xf32>
      %422 = arith.addf %419, %421 : vector<8x128xf32>
      %423 = vector.broadcast %104 : f32 to vector<8x128xf32>
      %424 = arith.mulf %237, %423 : vector<8x128xf32>
      %425 = arith.addf %422, %424 : vector<8x128xf32>
      %426 = vector.broadcast %105 : f32 to vector<8x128xf32>
      %427 = arith.mulf %257, %426 : vector<8x128xf32>
      %428 = arith.addf %425, %427 : vector<8x128xf32>
      %429 = vector.broadcast %106 : f32 to vector<8x128xf32>
      %430 = arith.mulf %277, %429 : vector<8x128xf32>
      %431 = arith.addf %428, %430 : vector<8x128xf32>
      %432 = vector.broadcast %107 : f32 to vector<8x128xf32>
      %433 = arith.mulf %297, %432 : vector<8x128xf32>
      %434 = arith.addf %431, %433 : vector<8x128xf32>
      %435 = vector.broadcast %108 : f32 to vector<8x128xf32>
      %436 = arith.mulf %317, %435 : vector<8x128xf32>
      %437 = arith.addf %434, %436 : vector<8x128xf32>
      %438 = vector.broadcast %109 : f32 to vector<8x128xf32>
      %439 = arith.mulf %337, %438 : vector<8x128xf32>
      %440 = arith.addf %437, %439 : vector<8x128xf32>
      %441 = vector.broadcast %110 : f32 to vector<8x128xf32>
      %442 = arith.mulf %357, %441 : vector<8x128xf32>
      %443 = arith.addf %440, %442 : vector<8x128xf32>
      %444 = vector.broadcast %111 : f32 to vector<8x128xf32>
      %445 = arith.mulf %377, %444 : vector<8x128xf32>
      %446 = arith.addf %443, %445 : vector<8x128xf32>
      %447 = vector.broadcast %112 : f32 to vector<8x128xf32>
      %448 = arith.mulf %397, %447 : vector<8x128xf32>
      %449 = arith.addf %446, %448 : vector<8x128xf32>
      %450 = vector.broadcast %113 : f32 to vector<8x128xf32>
      %451 = arith.mulf %417, %450 : vector<8x128xf32>
      %452 = arith.addf %449, %451 : vector<8x128xf32>
      %453 = vector.broadcast %114 : f32 to vector<8x128xf32>
      %454 = arith.addf %452, %453 : vector<8x128xf32>
      %455 = arith.index_cast %117 : i32 to index
      %c0_10 = arith.constant 0 : index
      %456 = vector.load %arg3[%455, %c0_10] : memref<16x128xf32, #tpu.memory_space<vmem>>, vector<8x128xf32>
      tpu.vector_store %arg3[%455, %c0_10], %454 {strides = array<i32>} : memref<16x128xf32, #tpu.memory_space<vmem>>, vector<8x128xf32>,
    }
    %c2_i32_0 = arith.constant 2 : i32
    return
  }
  func.func @transform_0(%arg0: i32) -> i32 {
    %c0_i32 = arith.constant 0 : i32
    %c0_i32_0 = arith.constant 0 : i32
    return %c0_i32 : i32
  }
  func.func @transform_1(%arg0: i32) -> (i32, i32, i32) {
    %c0_i32 = arith.constant 0 : i32
    %c0_i32_0 = arith.constant 0 : i32
    %c0_i32_1 = arith.constant 0 : i32
    return %c0_i32, %arg0, %c0_i32_0 : i32, i32, i32
  }
  func.func @transform_2(%arg0: i32) -> (i32, i32) {
    %c0_i32 = arith.constant 0 : i32
    %c0_i32_0 = arith.constant 0 : i32
    return %arg0, %c0_i32 : i32, i32
  }
}

</mosaic_0001>

<bundles_post_ra>
// kernel: ffnn_forward.1
= control target key start
LH: loop header
LB: loop body
LE: loop exit
PB: predicated region body
PF: predicated region fallthrough
CT: control target
= control target key end

     0   :  { %s1560_s0 = inlined_call_operand.vmem [shape: f32[115], index: 0, kind: input, shape index: {}]   ;;  %s1561_s1 = inlined_call_operand.vmem [shape: f32[2,32,128], index: 1, kind: input, shape index: {}]   ;;  %s1562_s2 = inlined_call_operand.vmem [shape: f32[32,128], index: 2, kind: output, shape index: {}]  }
   0x1   :  { %1568 = sst [smem:[#allocation109_spill]] %s1560_s0 }
   0x2   :  { %1569 = sst [smem:[#allocation110_spill]] %s1561_s1 }
   0x3   :  { %1570 = sst [smem:[#allocation111_spill]] %s1562_s2 }
   0x4   :  { %7 = vsyncpa [#allocation3], 0  ;;  %s1014_s9 = smov 0   ;;  %s1016_s10 = smov 0  }
   0x5   :  { %s1018_s11 = smov 0  }
   0x6 LB: > { %1571 = sst [smem:[#allocation6_spill]] %s988_s10  ;;  %s747_s12 = sadd.s32 4294967295, %s992_s11   ;;  %s992_s11 = sphi %s1018_s11, %s1782_s11   ;;  %s988_s10 = sphi %s1016_s10, %s1784_s10   ;;  %s984_s9 = sphi %s1014_s9, %s1783_s9  }
   0x7   : > { %s1031_s13 = sadd.s32 1, %s992_s11   ;;  %s41_s15 = sadd.s32 1, %s988_s10 }
   0x8   : > { %1572 = sst [smem:[#allocation7_spill]] %s1031_s13  ;;  %s38_s14 = ssub.s32 %s992_s11, %s1031_s13 }
   0x9   : > { %p39_p0 = scmp.eq.s32.totalorder %s38_s14, 0  ;;  %p48_p1 = scmp.ne.s32.totalorder %s988_s10, %s984_s9 }
   0xa   : > { %p49_p2 = scmp.eq.s32.totalorder %s992_s11, 0  ;;  %p749_p3 = scmp.ge.s32.totalorder %s992_s11, 1 }
   0xb   : > { %s1041_s16 = scalar_select %p39_p0, %s988_s10, %s41_s15  }
   0xc   : > { %p1043_p4 = por %p49_p2, %p48_p1  ;;  %p91_p5 = scmp.lt.s32.totalorder %s992_s11, 3 }
   0xd   : > { %1573 = sst [smem:[#allocation8_spill]] %s1041_s16  ;;  %p1050_p6 = scmp.eq.s32.totalorder %s747_s12, 0 }
   0xe   : > { %p1054_p7 = pnand %p749_p3, %p91_p5  ;;  %s1577_s0 = sld [smem:[#allocation109_spill]] }
  0x10   : > { %p884_p8 = pneg %p1054_p7 }
  0x12   : > { %p885_p9 = pnand %p1050_p6, %p884_p8 }
  0x14   : > { %s104_s22 = sshll.u32 %s1577_s0, 4  ;;  %p949_p11 = pneg %p885_p9  ;;  %s105_s22 = int_to_ptr.vmem [resolvable:$true] %s104_s22 }
  0x15   : > { %s947_s23 = scalar_lea.vmem %s105_s22, 16  ;;  %p955_p0 = scmp.lt.s32.totalorder %s105_s22, %s105_s22 }
  0x16   : > { %p948_p10 = scmp.ne.s32.totalorder %s105_s22, %s947_s23  ;;  %p956_p1 = scmp.lt.s32.totalorder %s947_s23, %s947_s23 }
  0x18   : > { %p950_p12 = pnand %p949_p11, %p948_p10  ;;  %p957_p2 = por %p956_p1, %p955_p0 }
  0x1a   : > { %p951_p13 = pneg %p950_p12 }
  0x1c   : > { %p958_p3 = pnand %p957_p2, %p951_p13 }
  0x1e   : > { %961 = shalt.err (!%p958_p3)
}
  0x1f   : > { %s998_s24 = smov [#allocation2]   ;;  %p751_p5 = scmp.ge.s32.totalorder %s992_s11, 2 }
  0x20   : > { %887 = dma.vmem_to_smem (!%p885_p9), %s105_s22, 16, %s998_s24, [#allocation3]  }
  0x21   : > { %111 = sbr.rel (%p751_p5) target bundleno = 52 (0x34), region = 20 }
  0x28   : > { %114 = sbr.rel (!%p1043_p4) target bundleno = 52 (0x34), region = 24  ;;  %s116_s25 = sand.u32 (%p1043_p4), 1, %s988_s10  }
  0x29   : > { %s879_s26 = sshll.u32 (%p1043_p4), %s992_s11, 4  ;;  %s752_s27 = sshll.u32 (%p1043_p4), %s116_s25, 5 }
  0x2a   : > { %s1578_s1 = sld [smem:[#allocation110_spill]] (%p1043_p4)  ;;  %s118_s3 = scalar_lea.vmem (%p1043_p4), [#allocation4], %s752_s27 }
  0x30   : > { %s121_s30 = scalar_lea.vmem %s1578_s1, %s879_s26 }
  0x31   : > { %v155_v0 = vld [vmem:[%s121_s30] sm:$0xff]  ;;  %v157_v1 = vld [vmem:[%s121_s30 + $0x8] sm:$0xff] }
  0x32   : > { %v159_v2 = vld [vmem:[%s121_s30 + $0x20] sm:$0xff]  ;;  %156 = vst [vmem:[%s118_s3] sm:$0xff] %v155_v0  ;;  %158 = vst [vmem:[%s118_s3 + $0x8] sm:$0xff] %v157_v1  ;;  %v161_v3 = vld [vmem:[%s121_s30 + $0x28] sm:$0xff] }
  0x33   : > { %160 = vst [vmem:[%s118_s3 + $0x10] sm:$0xff] %v159_v2  ;;  %162 = vst [vmem:[%s118_s3 + $0x18] sm:$0xff] %v161_v3 }
  0x34 PF: > { %171 = sbr.rel (%p1054_p7) target bundleno = 283 (0x11b), region = 62 }
  0x3b   : > { %979 = dma.done.wait (%p1050_p6), [#allocation3], 16  }
  0x3c   : > { %981 = vsyncadd (%p1050_p6), [#allocation3], 4294967280  ;;  %s178_s4 = sand.u32 1, %s984_s9  }
  0x3d   : > { %s1080_s5 = sshll.u32 %s178_s4, 5 }
  0x3e   : > { %1579 = sst [smem:[#allocation9_spill]] %s1080_s5 }
  0x3f   : > { %184 = sfence }
  0x40   : > { %s758_s7 = sshll.u32 %s747_s12, 1  ;;  %s1085_s8 = sld [smem:[#allocation2]] }
  0x41   : > { %p202_p4 = scmp.lt.s32.totalorder %s758_s7, 3  ;;  %s1087_s14 = sld [smem:[#allocation2 + $0x1]] }
  0x42   : > { %s1089_s15 = sld [smem:[#allocation2 + $0x2]]  ;;  %s1091_s17 = sld [smem:[#allocation2 + $0x3]] }
  0x43   : > { %s1786_s7 = smov (!%p202_p4, %s758_s7), 3  ;;  %s1093_s18 = sld [smem:[#allocation2 + $0x4]] }
  0x44   : > { %s1095_s9 = sld [smem:[#allocation2 + $0x5]]  ;;  %s759_s19 = sshll.u32 %s1786_s7, 3 }
  0x45   : > { %s1097_s20 = sld [smem:[#allocation2 + $0x6]]  ;;  %s1586_s2 = sld [smem:[#allocation111_spill]] }
  0x46   : > { %1580 = sst [smem:[#allocation10_spill]] %s1085_s8  ;;  %s1104_s22 = sld [smem:[#allocation2 + $0x7]] }
  0x47   : > { %1581 = sst [smem:[#allocation11_spill]] %s1087_s14  ;;  %s1106_s23 = sld [smem:[#allocation2 + $0x8]] }
  0x48   : > { %1582 = sst [smem:[#allocation12_spill]] %s1089_s15  ;;  %s1108_s24 = sld [smem:[#allocation2 + $0x9]] }
  0x49   : > { %1583 = sst [smem:[#allocation13_spill]] %s1091_s17  ;;  %s1110_s25 = sld [smem:[#allocation2 + $0xa]] }
  0x4a   : > { %1584 = sst [smem:[#allocation14_spill]] %s1093_s18  ;;  %s1112_s26 = sld [smem:[#allocation2 + $0xb]] }
  0x4b   : > { %1585 = sst [smem:[#allocation15_spill]] %s1095_s9  ;;  %s1102_s12 = scalar_lea.vmem %s1586_s2, %s759_s19 }
  0x4c   : > { %1587 = sst [smem:[#allocation16_spill]] %s1102_s12  ;;  %s1114_s27 = sld [smem:[#allocation2 + $0xc]] }
  0x4d   : > { %s1116_s28 = sld [smem:[#allocation2 + $0xd]]  ;;  %s1118_s29 = sld [smem:[#allocation2 + $0xe]] }
  0x4e   : > { %s1120_s30 = sld [smem:[#allocation2 + $0xf]]  ;;  %s1122_s3 = sld [smem:[#allocation2 + $0x10]] }
  0x4f   : > { %s1124_s4 = sld [smem:[#allocation2 + $0x11]]  ;;  %s1126_s7 = sld [smem:[#allocation2 + $0x12]] }
  0x50   : > { %s1128_s19 = sld [smem:[#allocation2 + $0x13]]  ;;  %s1130_s21 = sld [smem:[#allocation2 + $0x14]] }
  0x51   : > { %s1132_s11 = sld [smem:[#allocation2 + $0x15]]  ;;  %s1134_s6 = sld [smem:[#allocation2 + $0x16]] }
  0x52   : > { %s1136_s0 = sld [smem:[#allocation2 + $0x17]]  ;;  %s1138_s1 = sld [smem:[#allocation2 + $0x18]] }
  0x53   : > { %s1140_s2 = sld [smem:[#allocation2 + $0x19]]  ;;  %s1142_s16 = sld [smem:[#allocation2 + $0x1a]] }
  0x54   : > { %1588 = sst [smem:[#allocation17_spill]] %s1122_s3  ;;  %s1146_s13 = sld [smem:[#allocation2 + $0x1c]] }
  0x55   : > { %1589 = sst [smem:[#allocation18_spill]] %s1124_s4  ;;  %s1144_s10 = sld [smem:[#allocation2 + $0x1b]] }
  0x56   : > { %1590 = sst [smem:[#allocation19_spill]] %s1126_s7 }
  0x57   : > { %1591 = sst [smem:[#allocation20_spill]] %s1128_s19  ;;  %s1148_s12 = sld [smem:[#allocation2 + $0x1d]] }
  0x58   : > { %1592 = sst [smem:[#allocation21_spill]] %s1130_s21  ;;  %s1150_s19 = sld [smem:[#allocation2 + $0x1e]] }
  0x59   : > { %1593 = sst [smem:[#allocation22_spill]] %s1132_s11  ;;  %s1152_s21 = sld [smem:[#allocation2 + $0x1f]] }
  0x5a   : > { %1594 = sst [smem:[#allocation23_spill]] %s1134_s6  ;;  %s1154_s11 = sld [smem:[#allocation2 + $0x20]] }
  0x5b   : > { %1595 = sst [smem:[#allocation24_spill]] %s1136_s0  ;;  %s1156_s6 = sld [smem:[#allocation2 + $0x21]] }
  0x5c   : > { %1596 = sst [smem:[#allocation25_spill]] %s1138_s1  ;;  %s1158_s0 = sld [smem:[#allocation2 + $0x22]] }
  0x5d   : > { %1597 = sst [smem:[#allocation26_spill]] %s1140_s2  ;;  %s1160_s1 = sld [smem:[#allocation2 + $0x23]] }
  0x5e   : > { %1598 = sst [smem:[#allocation27_spill]] %s1142_s16  ;;  %s1162_s2 = sld [smem:[#allocation2 + $0x24]] }
  0x5f   : > { %1599 = sst [smem:[#allocation28_spill]] %s1144_s10  ;;  %s1164_s16 = sld [smem:[#allocation2 + $0x25]] }
  0x60   : > { %1600 = sst [smem:[#allocation29_spill]] %s1146_s13  ;;  %s1166_s10 = sld [smem:[#allocation2 + $0x26]] }
  0x61   : > { %1601 = sst [smem:[#allocation30_spill]] %s1148_s12  ;;  %s1168_s13 = sld [smem:[#allocation2 + $0x27]] }
  0x62   : > { %1602 = sst [smem:[#allocation31_spill]] %s1150_s19  ;;  %s1170_s12 = sld [smem:[#allocation2 + $0x28]] }
  0x63   : > { %1603 = sst [smem:[#allocation32_spill]] %s1152_s21  ;;  %s1172_s19 = sld [smem:[#allocation2 + $0x29]] }
  0x64   : > { %1604 = sst [smem:[#allocation33_spill]] %s1154_s11  ;;  %s1174_s21 = sld [smem:[#allocation2 + $0x2a]] }
  0x65   : > { %1605 = sst [smem:[#allocation34_spill]] %s1156_s6  ;;  %s1176_s11 = sld [smem:[#allocation2 + $0x2b]] }
  0x66   : > { %1606 = sst [smem:[#allocation35_spill]] %s1158_s0  ;;  %s1178_s6 = sld [smem:[#allocation2 + $0x2c]] }
  0x67   : > { %1607 = sst [smem:[#allocation36_spill]] %s1160_s1  ;;  %s1180_s0 = sld [smem:[#allocation2 + $0x2d]] }
  0x68   : > { %1608 = sst [smem:[#allocation37_spill]] %s1162_s2  ;;  %s1182_s1 = sld [smem:[#allocation2 + $0x2e]] }
  0x69   : > { %1609 = sst [smem:[#allocation38_spill]] %s1164_s16  ;;  %s1184_s2 = sld [smem:[#allocation2 + $0x2f]] }
  0x6a   : > { %1610 = sst [smem:[#allocation39_spill]] %s1166_s10  ;;  %s1186_s16 = sld [smem:[#allocation2 + $0x30]] }
  0x6b   : > { %1611 = sst [smem:[#allocation40_spill]] %s1168_s13  ;;  %s1188_s10 = sld [smem:[#allocation2 + $0x31]] }
  0x6c   : > { %1612 = sst [smem:[#allocation41_spill]] %s1170_s12  ;;  %s1190_s13 = sld [smem:[#allocation2 + $0x32]] }
  0x6d   : > { %1613 = sst [smem:[#allocation42_spill]] %s1172_s19  ;;  %s1192_s12 = sld [smem:[#allocation2 + $0x33]] }
  0x6e   : > { %1614 = sst [smem:[#allocation43_spill]] %s1174_s21  ;;  %s1194_s19 = sld [smem:[#allocation2 + $0x34]] }
  0x6f   : > { %1615 = sst [smem:[#allocation44_spill]] %s1176_s11  ;;  %s1196_s21 = sld [smem:[#allocation2 + $0x35]] }
  0x70   : > { %1616 = sst [smem:[#allocation45_spill]] %s1178_s6  ;;  %s1198_s11 = sld [smem:[#allocation2 + $0x36]] }
  0x71   : > { %1617 = sst [smem:[#allocation46_spill]] %s1180_s0  ;;  %s1200_s6 = sld [smem:[#allocation2 + $0x37]] }
  0x72   : > { %1618 = sst [smem:[#allocation47_spill]] %s1182_s1  ;;  %s1202_s0 = sld [smem:[#allocation2 + $0x38]] }
  0x73   : > { %1619 = sst [smem:[#allocation48_spill]] %s1184_s2  ;;  %s1204_s1 = sld [smem:[#allocation2 + $0x39]] }
  0x74   : > { %1620 = sst [smem:[#allocation49_spill]] %s1186_s16  ;;  %s1206_s2 = sld [smem:[#allocation2 + $0x3a]] }
  0x75   : > { %1621 = sst [smem:[#allocation50_spill]] %s1188_s10  ;;  %s1208_s16 = sld [smem:[#allocation2 + $0x3b]] }
  0x76   : > { %1622 = sst [smem:[#allocation51_spill]] %s1190_s13  ;;  %s1210_s10 = sld [smem:[#allocation2 + $0x3c]] }
  0x77   : > { %1623 = sst [smem:[#allocation52_spill]] %s1192_s12  ;;  %s1212_s13 = sld [smem:[#allocation2 + $0x3d]] }
  0x78   : > { %1624 = sst [smem:[#allocation53_spill]] %s1194_s19  ;;  %s1214_s12 = sld [smem:[#allocation2 + $0x3e]] }
  0x79   : > { %1625 = sst [smem:[#allocation54_spill]] %s1196_s21  ;;  %s1216_s19 = sld [smem:[#allocation2 + $0x3f]] }
  0x7a   : > { %1626 = sst [smem:[#allocation55_spill]] %s1198_s11  ;;  %s1218_s21 = sld [smem:[#allocation2 + $0x40]] }
  0x7b   : > { %1627 = sst [smem:[#allocation56_spill]] %s1200_s6  ;;  %s1220_s11 = sld [smem:[#allocation2 + $0x41]] }
  0x7c   : > { %1628 = sst [smem:[#allocation57_spill]] %s1202_s0  ;;  %s1222_s6 = sld [smem:[#allocation2 + $0x42]] }
  0x7d   : > { %1629 = sst [smem:[#allocation58_spill]] %s1204_s1  ;;  %s1224_s0 = sld [smem:[#allocation2 + $0x43]] }
  0x7e   : > { %1630 = sst [smem:[#allocation59_spill]] %s1206_s2  ;;  %s1226_s1 = sld [smem:[#allocation2 + $0x44]] }
  0x7f   : > { %1631 = sst [smem:[#allocation60_spill]] %s1208_s16  ;;  %s1228_s2 = sld [smem:[#allocation2 + $0x45]] }
  0x80   : > { %1632 = sst [smem:[#allocation61_spill]] %s1210_s10  ;;  %s1230_s16 = sld [smem:[#allocation2 + $0x46]] }
  0x81   : > { %1633 = sst [smem:[#allocation62_spill]] %s1212_s13  ;;  %s1232_s10 = sld [smem:[#allocation2 + $0x47]] }
  0x82   : > { %1634 = sst [smem:[#allocation63_spill]] %s1214_s12  ;;  %s1234_s13 = sld [smem:[#allocation2 + $0x48]] }
  0x83   : > { %1635 = sst [smem:[#allocation64_spill]] %s1216_s19  ;;  %s1236_s12 = sld [smem:[#allocation2 + $0x49]] }
  0x84   : > { %1636 = sst [smem:[#allocation65_spill]] %s1218_s21  ;;  %s1238_s19 = sld [smem:[#allocation2 + $0x4a]] }
  0x85   : > { %1637 = sst [smem:[#allocation66_spill]] %s1220_s11  ;;  %s1240_s21 = sld [smem:[#allocation2 + $0x4b]] }
  0x86   : > { %1638 = sst [smem:[#allocation67_spill]] %s1222_s6  ;;  %s1242_s11 = sld [smem:[#allocation2 + $0x4c]] }
  0x87   : > { %1639 = sst [smem:[#allocation68_spill]] %s1224_s0  ;;  %s1244_s6 = sld [smem:[#allocation2 + $0x4d]] }
  0x88   : > { %1640 = sst [smem:[#allocation69_spill]] %s1226_s1  ;;  %s1246_s0 = sld [smem:[#allocation2 + $0x4e]] }
  0x89   : > { %1641 = sst [smem:[#allocation70_spill]] %s1228_s2  ;;  %s1248_s1 = sld [smem:[#allocation2 + $0x4f]] }
  0x8a   : > { %1642 = sst [smem:[#allocation71_spill]] %s1230_s16  ;;  %s1250_s2 = sld [smem:[#allocation2 + $0x50]] }
  0x8b   : > { %1643 = sst [smem:[#allocation72_spill]] %s1232_s10  ;;  %s1252_s16 = sld [smem:[#allocation2 + $0x51]] }
  0x8c   : > { %1644 = sst [smem:[#allocation73_spill]] %s1234_s13  ;;  %s1254_s10 = sld [smem:[#allocation2 + $0x52]] }
  0x8d   : > { %1645 = sst [smem:[#allocation74_spill]] %s1236_s12  ;;  %s1256_s13 = sld [smem:[#allocation2 + $0x53]] }
  0x8e   : > { %1646 = sst [smem:[#allocation75_spill]] %s1238_s19  ;;  %s1258_s12 = sld [smem:[#allocation2 + $0x54]] }
  0x8f   : > { %1647 = sst [smem:[#allocation76_spill]] %s1240_s21  ;;  %s1260_s19 = sld [smem:[#allocation2 + $0x55]] }
  0x90   : > { %1648 = sst [smem:[#allocation77_spill]] %s1242_s11  ;;  %s1262_s21 = sld [smem:[#allocation2 + $0x56]] }
  0x91   : > { %1649 = sst [smem:[#allocation78_spill]] %s1244_s6  ;;  %s1264_s11 = sld [smem:[#allocation2 + $0x57]] }
  0x92   : > { %1650 = sst [smem:[#allocation79_spill]] %s1246_s0  ;;  %s1266_s6 = sld [smem:[#allocation2 + $0x58]] }
  0x93   : > { %1651 = sst [smem:[#allocation80_spill]] %s1248_s1  ;;  %s1268_s0 = sld [smem:[#allocation2 + $0x59]] }
  0x94   : > { %1652 = sst [smem:[#allocation81_spill]] %s1250_s2  ;;  %s1270_s1 = sld [smem:[#allocation2 + $0x5a]] }
  0x95   : > { %1653 = sst [smem:[#allocation82_spill]] %s1252_s16  ;;  %s1272_s2 = sld [smem:[#allocation2 + $0x5b]] }
  0x96   : > { %1654 = sst [smem:[#allocation83_spill]] %s1254_s10  ;;  %s1274_s16 = sld [smem:[#allocation2 + $0x5c]] }
  0x97   : > { %1655 = sst [smem:[#allocation84_spill]] %s1256_s13  ;;  %s1276_s10 = sld [smem:[#allocation2 + $0x5d]] }
  0x98   : > { %1656 = sst [smem:[#allocation85_spill]] %s1258_s12  ;;  %s1278_s13 = sld [smem:[#allocation2 + $0x5e]] }
  0x99   : > { %1657 = sst [smem:[#allocation86_spill]] %s1260_s19  ;;  %s1280_s12 = sld [smem:[#allocation2 + $0x5f]] }
  0x9a   : > { %1658 = sst [smem:[#allocation87_spill]] %s1262_s21  ;;  %s1282_s19 = sld [smem:[#allocation2 + $0x60]] }
  0x9b   : > { %1659 = sst [smem:[#allocation88_spill]] %s1264_s11  ;;  %s1284_s21 = sld [smem:[#allocation2 + $0x61]] }
  0x9c   : > { %1660 = sst [smem:[#allocation89_spill]] %s1266_s6  ;;  %s1286_s11 = sld [smem:[#allocation2 + $0x62]] }
  0x9d   : > { %1661 = sst [smem:[#allocation90_spill]] %s1268_s0  ;;  %s1288_s6 = sld [smem:[#allocation2 + $0x63]] }
  0x9e   : > { %1662 = sst [smem:[#allocation91_spill]] %s1270_s1  ;;  %s1290_s0 = sld [smem:[#allocation2 + $0x64]] }
  0x9f   : > { %1663 = sst [smem:[#allocation92_spill]] %s1272_s2  ;;  %s1292_s1 = sld [smem:[#allocation2 + $0x65]] }
  0xa0   : > { %1664 = sst [smem:[#allocation93_spill]] %s1274_s16  ;;  %s1294_s2 = sld [smem:[#allocation2 + $0x66]] }
  0xa1   : > { %1665 = sst [smem:[#allocation94_spill]] %s1276_s10  ;;  %s1296_s16 = sld [smem:[#allocation2 + $0x67]] }
  0xa2   : > { %1666 = sst [smem:[#allocation95_spill]] %s1278_s13  ;;  %s1298_s10 = sld [smem:[#allocation2 + $0x68]] }
  0xa3   : > { %1667 = sst [smem:[#allocation96_spill]] %s1280_s12  ;;  %s1300_s13 = sld [smem:[#allocation2 + $0x69]] }
  0xa4   : > { %1668 = sst [smem:[#allocation97_spill]] %s1282_s19  ;;  %s1302_s12 = sld [smem:[#allocation2 + $0x6a]] }
  0xa5   : > { %1669 = sst [smem:[#allocation98_spill]] %s1284_s21  ;;  %s1304_s19 = sld [smem:[#allocation2 + $0x6b]] }
  0xa6   : > { %1670 = sst [smem:[#allocation99_spill]] %s1286_s11  ;;  %s1306_s21 = sld [smem:[#allocation2 + $0x6c]] }
  0xa7   : > { %1671 = sst [smem:[#allocation100_spill]] %s1288_s6  ;;  %s1308_s11 = sld [smem:[#allocation2 + $0x6d]] }
  0xa8   : > { %1672 = sst [smem:[#allocation101_spill]] %s1290_s0  ;;  %s1310_s6 = sld [smem:[#allocation2 + $0x6e]] }
  0xa9   : > { %1673 = sst [smem:[#allocation102_spill]] %s1292_s1  ;;  %s1312_s0 = sld [smem:[#allocation2 + $0x6f]] }
  0xaa   : > { %1674 = sst [smem:[#allocation103_spill]] %s1294_s2  ;;  %s1314_s1 = sld [smem:[#allocation2 + $0x70]] }
  0xab   : > { %1675 = sst [smem:[#allocation104_spill]] %s1296_s16  ;;  %s1316_s2 = sld [smem:[#allocation2 + $0x71]] }
  0xac   : > { %1676 = sst [smem:[#allocation105_spill]] %s1298_s10  ;;  %s1318_s16 = sld [smem:[#allocation2 + $0x72]] }
  0xad   : > { %s1320_s10 = smov 0  }
  0xb0   : > { %1677 = sst [smem:[#allocation106_spill]] %s1314_s1 }
  0xb1   : > { %1678 = sst [smem:[#allocation107_spill]] %s1316_s2 }
  0xb2   : > { %1679 = sst [smem:[#allocation108_spill]] %s1318_s16 }
  0xb3 LB: >> { %s1680_s8 = sld [smem:[#allocation10_spill]]  ;;  %s1681_s14 = sld [smem:[#allocation11_spill]]  ;;  %v336_v5 = vstv %s1097_s20  ;;  %v339_v6 = vstv %s1114_s27  ;;  %v344_v8 = vstv %s1104_s22  ;;  %v347_v9 = vstv %s1116_s28  ;;  %s996_s10 = sphi %s1320_s10, %s327_s10  }
  0xb4   : >> { %s1682_s15 = sld [smem:[#allocation12_spill]]  ;;  %s1683_s17 = sld [smem:[#allocation13_spill]]  ;;  %v352_v11 = vstv %s1106_s23  ;;  %v355_v12 = vstv %s1118_s29  ;;  %v360_v14 = vstv %s1108_s24  ;;  %v363_v15 = vstv %s1120_s30 }
  0xb5   : >> { %s1684_s5 = sld [smem:[#allocation9_spill]]  ;;  %s1685_s18 = sld [smem:[#allocation14_spill]]  ;;  %v368_v17 = vstv %s1110_s25  ;;  %v376_v22 = vstv %s1112_s26 }
  0xb6   : >> { %s1686_s3 = sld [smem:[#allocation17_spill]]  ;;  %s1687_s9 = sld [smem:[#allocation15_spill]] }
  0xb7   : >> { %s1688_s4 = sld [smem:[#allocation18_spill]]  ;;  %s1566_s16 = sshll.u32 %s996_s10, 3 }
  0xb8   : >> { %s1690_s7 = sld [smem:[#allocation19_spill]] }
  0xb9   : >> { %v334_v4 = vstv %s1680_s8  ;;  %v342_v7 = vstv %s1681_s14  ;;  %s1691_s8 = sld [smem:[#allocation31_spill]]  ;;  %s1703_s14 = sld [smem:[#allocation33_spill]] }
  0xba   : >> { %v350_v10 = vstv %s1682_s15  ;;  %v358_v13 = vstv %s1683_s17  ;;  %s1704_s15 = sld [smem:[#allocation45_spill]] }
  0xbb   : >> { %s1689_s2 = scalar_lea.vmem [#allocation4], %s1684_s5  ;;  %v366_v16 = vstv %s1685_s18  ;;  %s1697_s5 = sld [smem:[#allocation32_spill]] }
  0xbc   : >> { %s329_s1 = scalar_lea.vmem %s1689_s2, %s1566_s16 [#allocation4]  ;;  %v371_v18 = vstv %s1686_s3  ;;  %v374_v19 = vstv %s1687_s9  ;;  %s1692_s2 = sld [smem:[#allocation43_spill]] }
  0xbd   : >> { %v330_v20 = vld [vmem:[%s329_s1] sm:$0xff]  ;;  %v876_v21 = vld [vmem:[%s329_s1 + $0x10] sm:$0xff]  ;;  %v379_v23 = vstv %s1688_s4  ;;  %s1693_s1 = sld [smem:[#allocation55_spill]]  ;;  %s1694_s16 = sld [smem:[#allocation67_spill]] }
  0xbe   : >> { %v335_v24 = vmul.f32 %v334_v4, %v330_v20  ;;  %v337_v25 = vmul.f32 %v876_v21, %v336_v5  ;;  %v343_v26 = vmul.f32 %v342_v7, %v330_v20  ;;  %v345_v27 = vmul.f32 %v876_v21, %v344_v8  ;;  %s1695_s3 = sld [smem:[#allocation79_spill]]  ;;  %s1696_s4 = sld [smem:[#allocation20_spill]] }
  0xbf   : >> { %v351_v28 = vmul.f32 %v350_v10, %v330_v20  ;;  %v353_v29 = vmul.f32 %v876_v21, %v352_v11  ;;  %v359_v30 = vmul.f32 %v358_v13, %v330_v20  ;;  %v361_v31 = vmul.f32 %v876_v21, %v360_v14  ;;  %s1698_s9 = sld [smem:[#allocation44_spill]]  ;;  %s1708_s17 = sld [smem:[#allocation69_spill]] }
  0xc0   : >> { %v338_v32 = vadd.f32 %v337_v25, %v335_v24  ;;  %v346_v33 = vadd.f32 %v345_v27, %v343_v26  ;;  %v367_v34 = vmul.f32 %v366_v16, %v330_v20  ;;  %v369_v35 = vmul.f32 %v876_v21, %v368_v17  ;;  %s1713_s18 = sld [smem:[#allocation58_spill]] }
  0xc1   : >> { %v354_v36 = vadd.f32 %v353_v29, %v351_v28  ;;  %v362_v37 = vadd.f32 %v361_v31, %v359_v30  ;;  %v375_v38 = vmul.f32 %v374_v19, %v330_v20  ;;  %v377_v39 = vmul.f32 %v876_v21, %v376_v22 }
  0xc2   : >> { %v340_v40 = vadd.f32 %v339_v6, %v338_v32  ;;  %v348_v41 = vadd.f32 %v347_v9, %v346_v33  ;;  %v370_v42 = vadd.f32 %v369_v35, %v367_v34  ;;  %v382_v43 = vstv %s1690_s7  ;;  %s1701_s7 = sld [smem:[#allocation80_spill]] }
  0xc3   : >> { %v356_v44 = vadd.f32 %v355_v12, %v354_v36  ;;  %v364_v45 = vadd.f32 %v363_v15, %v362_v37  ;;  %v378_v46 = vadd.f32 %v377_v39, %v375_v38  ;;  %v384_v47 = vstv %s1691_s8  ;;  %s1699_s8 = sld [smem:[#allocation56_spill]] }
  0xc4   : >> { %v1350_v48 = vmax.f32 %v340_v40, 0.0  ;;  %v1352_v49 = vmax.f32 %v348_v41, 0.0  ;;  %v372_v50 = vadd.f32 %v371_v18, %v370_v42  ;;  %v387_v51 = vstv %s1692_s2  ;;  %s1700_s2 = sld [smem:[#allocation68_spill]] }
  0xc5   : >> { %v1355_v52 = vmax.f32 %v356_v44, 0.0  ;;  %v1357_v53 = vmax.f32 %v364_v45, 0.0  ;;  %v380_v54 = vadd.f32 %v379_v23, %v378_v46  ;;  %v390_v55 = vstv %s1693_s1  ;;  %s1702_s1 = sld [smem:[#allocation21_spill]] }
  0xc6   : >> { %v1360_v56 = vmax.f32 %v372_v50, 0.0  ;;  %v383_v57 = vmul.f32 %v382_v43, %v1350_v48  ;;  %v385_v58 = vmul.f32 %v384_v47, %v1352_v49  ;;  %v393_v59 = vstv %s1694_s16  ;;  %s1705_s16 = sld [smem:[#allocation57_spill]] }
  0xc7   : >> { %v1365_v60 = vmax.f32 %v380_v54, 0.0  ;;  %v388_v61 = vmul.f32 %v387_v51, %v1355_v52  ;;  %v391_v63 = vmul.f32 %v390_v55, %v1357_v53  ;;  %v396_v0 = vstv %s1695_s3  ;;  %s1706_s3 = sld [smem:[#allocation91_spill]] }
  0xc8   : >> { %v386_v62 = vadd.f32 %v385_v58, %v383_v57  ;;  %v402_v1 = vstv %s1696_s4  ;;  %v394_v2 = vmul.f32 %v393_v59, %v1360_v56  ;;  %v404_v4 = vstv %s1697_s5  ;;  %s1707_s4 = sld [smem:[#allocation92_spill]]  ;;  %s1709_s5 = sld [smem:[#allocation81_spill]] }
  0xc9   : >> { %v403_v3 = vmul.f32 %v402_v1, %v1350_v48  ;;  %v407_v5 = vstv %s1698_s9  ;;  %v405_v7 = vmul.f32 %v404_v4, %v1352_v49  ;;  %v410_v9 = vstv %s1699_s8  ;;  %s1710_s9 = sld [smem:[#allocation22_spill]]  ;;  %s1711_s8 = sld [smem:[#allocation34_spill]] }
  0xca   : >> { %v389_v6 = vadd.f32 %v388_v61, %v386_v62  ;;  %v408_v8 = vmul.f32 %v407_v5, %v1355_v52  ;;  %v397_v10 = vmul.f32 %v396_v0, %v1365_v60  ;;  %v411_v11 = vmul.f32 %v410_v9, %v1357_v53 }
  0xcb   : >> { %v413_v12 = vstv %s1700_s2  ;;  %v406_v14 = vadd.f32 %v405_v7, %v403_v3  ;;  %v416_v16 = vstv %s1701_s7  ;;  %v422_v17 = vstv %s1702_s1  ;;  %s1712_s2 = sld [smem:[#allocation46_spill]]  ;;  %s1718_s1 = sld [smem:[#allocation35_spill]] }
  0xcc   : >> { %v392_v13 = vadd.f32 %v391_v63, %v389_v6  ;;  %v414_v15 = vmul.f32 %v413_v12, %v1360_v56  ;;  %v424_v18 = vstv %s1703_s14  ;;  %v427_v19 = vstv %s1704_s15  ;;  %s1714_s7 = sld [smem:[#allocation70_spill]]  ;;  %s1715_s14 = sld [smem:[#allocation93_spill]] }
  0xcd   : >> { %v430_v20 = vstv %s1705_s16  ;;  %v409_v22 = vadd.f32 %v408_v8, %v406_v14  ;;  %v423_v23 = vmul.f32 %v422_v17, %v1350_v48  ;;  %v425_v24 = vmul.f32 %v424_v18, %v1352_v49  ;;  %s1716_s15 = sld [smem:[#allocation82_spill]]  ;;  %s1719_s16 = sld [smem:[#allocation47_spill]] }
  0xce   : >> { %v395_v21 = vadd.f32 %v394_v2, %v392_v13  ;;  %v399_v25 = vstv %s1706_s3  ;;  %v419_v26 = vstv %s1707_s4  ;;  %v428_v27 = vmul.f32 %v427_v19, %v1355_v52  ;;  %s1720_s3 = sld [smem:[#allocation59_spill]]  ;;  %s1721_s4 = sld [smem:[#allocation71_spill]] }
  0xcf   : >> { %v433_v28 = vstv %s1708_s17  ;;  %v412_v29 = vadd.f32 %v411_v11, %v409_v22  ;;  %v417_v30 = vmul.f32 %v416_v16, %v1365_v60  ;;  %v426_v31 = vadd.f32 %v425_v24, %v423_v23  ;;  %s1717_s17 = sld [smem:[#allocation23_spill]] }
  0xd0   : >> { %v431_v32 = vmul.f32 %v430_v20, %v1357_v53  ;;  %v398_v33 = vadd.f32 %v397_v10, %v395_v21  ;;  %v436_v34 = vstv %s1709_s5  ;;  %v442_v35 = vstv %s1710_s9  ;;  %s1722_s5 = sld [smem:[#allocation94_spill]]  ;;  %s1724_s9 = sld [smem:[#allocation24_spill]] }
  0xd1   : >> { %v444_v36 = vstv %s1711_s8  ;;  %v415_v37 = vadd.f32 %v414_v15, %v412_v29  ;;  %v429_v38 = vadd.f32 %v428_v27, %v426_v31  ;;  %v434_v39 = vmul.f32 %v433_v28, %v1360_v56  ;;  %s1725_s8 = sld [smem:[#allocation36_spill]] }
  0xd2   : >> { %v443_v40 = vmul.f32 %v442_v35, %v1350_v48  ;;  %v445_v41 = vmul.f32 %v444_v36, %v1352_v49  ;;  %v447_v42 = vstv %s1712_s2  ;;  %v450_v43 = vstv %s1713_s18  ;;  %s1723_s18 = sld [smem:[#allocation83_spill]]  ;;  %s1726_s2 = sld [smem:[#allocation48_spill]] }
  0xd3   : >> { %v453_v44 = vstv %s1714_s7  ;;  %v418_v45 = vadd.f32 %v417_v30, %v415_v37  ;;  %v432_v46 = vadd.f32 %v431_v32, %v429_v38  ;;  %v437_v47 = vmul.f32 %v436_v34, %v1365_v60  ;;  %s1727_s7 = sld [smem:[#allocation60_spill]] }
  0xd4   : >> { %v448_v50 = vmul.f32 %v447_v42, %v1355_v52  ;;  %v439_v51 = vstv %s1715_s14  ;;  %v446_v54 = vadd.f32 %v445_v41, %v443_v40  ;;  %v451_v55 = vmul.f32 %v450_v43, %v1357_v53  ;;  %s1728_s14 = sld [smem:[#allocation95_spill]] }
  0xd5   : >> { %v456_v57 = vstv %s1716_s15  ;;  %v400_v58 = vadd.f32 %v399_v25, %v398_v33  ;;  %v420_v59 = vadd.f32 %v419_v26, %v418_v45  ;;  %v435_v61 = vadd.f32 %v434_v39, %v432_v46  ;;  %s1729_s15 = sld [smem:[#allocation72_spill]] }
  0xd6   : >> { %v454_v62 = vmul.f32 %v453_v44, %v1360_v56  ;;  %v449_v63 = vadd.f32 %v448_v50, %v446_v54  ;;  %v462_v0 = vstv %s1717_s17  ;;  %v464_v1 = vstv %s1718_s1  ;;  %s1730_s17 = sld [smem:[#allocation84_spill]]  ;;  %s1731_s1 = sld [smem:[#allocation25_spill]] }
  0xd7   : >> { %v467_v2 = vstv %s1719_s16  ;;  %v438_v3 = vadd.f32 %v437_v47, %v435_v61  ;;  %v457_v4 = vmul.f32 %v456_v57, %v1365_v60  ;;  %v463_v5 = vmul.f32 %v462_v0, %v1350_v48  ;;  %s1732_s16 = sld [smem:[#allocation37_spill]] }
  0xd8   : >> { %v465_v6 = vmul.f32 %v464_v1, %v1352_v49  ;;  %v452_v7 = vadd.f32 %v451_v55, %v449_v63  ;;  %v468_v8 = vmul.f32 %v467_v2, %v1355_v52  ;;  %v470_v9 = vstv %s1720_s3  ;;  %s1733_s3 = sld [smem:[#allocation49_spill]] }
  0xd9   : >> { %v473_v10 = vstv %s1721_s4  ;;  %923 = vtanh.f32 %v400_v58  ;;  %v459_v11 = vstv %s1722_s5  ;;  %v471_v13 = vmul.f32 %v470_v9, %v1357_v53  ;;  %s1734_s4 = sld [smem:[#allocation61_spill]]  ;;  %s1735_s5 = sld [smem:[#allocation73_spill]] }
  0xda   : >> { %v466_v12 = vadd.f32 %v465_v6, %v463_v5  ;;  %v440_v14 = vadd.f32 %v439_v51, %v438_v3  ;;  %v455_v15 = vadd.f32 %v454_v62, %v452_v7  ;;  %v476_v16 = vstv %s1723_s18  ;;  %s1736_s18 = sld [smem:[#allocation85_spill]] }
  0xdb   : >> { %v482_v17 = vstv %s1724_s9  ;;  %925 = vtanh.f32 %v420_v59  ;;  %v474_v19 = vmul.f32 %v473_v10, %v1360_v56  ;;  %v484_v22 = vstv %s1725_s8  ;;  %s1737_s9 = sld [smem:[#allocation96_spill]]  ;;  %s1738_s8 = sld [smem:[#allocation26_spill]] }
  0xdc   : >> { %v469_v18 = vadd.f32 %v468_v8, %v466_v12  ;;  %v483_v20 = vmul.f32 %v482_v17, %v1350_v48  ;;  %v458_v21 = vadd.f32 %v457_v4, %v455_v15  ;;  %v487_v23 = vstv %s1726_s2  ;;  %s1739_s2 = sld [smem:[#allocation38_spill]] }
  0xdd   : >> { %v490_v24 = vstv %s1727_s7  ;;  %v477_v26 = vmul.f32 %v476_v16, %v1365_v60  ;;  %v485_v27 = vmul.f32 %v484_v22, %v1352_v49  ;;  %v488_v28 = vmul.f32 %v487_v23, %v1355_v52  ;;  %s1740_s7 = sld [smem:[#allocation50_spill]] }
  0xde   : >> { %v472_v25 = vadd.f32 %v471_v13, %v469_v18  ;;  %927 = vtanh.f32 %v440_v14  ;;  %v479_v29 = vstv %s1728_s14  ;;  %v491_v30 = vmul.f32 %v490_v24, %v1357_v53  ;;  %s1741_s14 = sld [smem:[#allocation62_spill]] }
  0xdf   : >> { %v493_v31 = vstv %s1729_s15  ;;  %v460_v32 = vadd.f32 %v459_v11, %v458_v21  ;;  %v486_v34 = vadd.f32 %v485_v27, %v483_v20  ;;  %v496_v35 = vstv %s1730_s17  ;;  %s1742_s15 = sld [smem:[#allocation97_spill]]  ;;  %s1743_s17 = sld [smem:[#allocation74_spill]] }
  0xe0   : >> { %v475_v33 = vadd.f32 %v474_v19, %v472_v25  ;;  %v494_v36 = vmul.f32 %v493_v31, %v1360_v56  ;;  %v502_v37 = vstv %s1731_s1  ;;  %v504_v38 = vstv %s1732_s16  ;;  %s1744_s1 = sld [smem:[#allocation86_spill]]  ;;  %s1745_s16 = sld [smem:[#allocation27_spill]] }
  0xe1   : >> { %v507_v39 = vstv %s1733_s3  ;;  %v489_v41 = vadd.f32 %v488_v28, %v486_v34  ;;  %v503_v42 = vmul.f32 %v502_v37, %v1350_v48  ;;  %v505_v43 = vmul.f32 %v504_v38, %v1352_v49  ;;  %s1746_s3 = sld [smem:[#allocation39_spill]] }
  0xe2   : >> { %v478_v40 = vadd.f32 %v477_v26, %v475_v33  ;;  %v497_v44 = vmul.f32 %v496_v35, %v1365_v60  ;;  %v508_v45 = vmul.f32 %v507_v39, %v1355_v52  ;;  %v510_v46 = vstv %s1734_s4  ;;  %s1747_s4 = sld [smem:[#allocation51_spill]] }
  0xe3   : >> { %v513_v47 = vstv %s1735_s5  ;;  %v1445_v50 = vpop.eup %923  ;;  %v492_v51 = vadd.f32 %v491_v30, %v489_v41  ;;  %v506_v54 = vadd.f32 %v505_v43, %v503_v42  ;;  %v511_v55 = vmul.f32 %v510_v46, %v1357_v53  ;;  %s1748_s5 = sld [smem:[#allocation63_spill]] }
  0xe4   : >> { %v516_v57 = vstv %s1736_s18  ;;  %929 = vtanh.f32 %v460_v32  ;;  %v480_v58 = vadd.f32 %v479_v29, %v478_v40  ;;  %v499_v59 = vstv %s1737_s9  ;;  %s1749_s18 = sld [smem:[#allocation98_spill]]  ;;  %s1750_s9 = sld [smem:[#allocation75_spill]] }
  0xe5   : >> { %v522_v61 = vstv %s1738_s8  ;;  %v1451_v62 = vpop.eup %925  ;;  %v495_v63 = vadd.f32 %v494_v36, %v492_v51  ;;  %v509_v0 = vadd.f32 %v508_v45, %v506_v54  ;;  %v514_v1 = vmul.f32 %v513_v47, %v1360_v56  ;;  %s1751_s8 = sld [smem:[#allocation87_spill]] }
  0xe6   : >> { %v523_v2 = vmul.f32 %v522_v61, %v1350_v48  ;;  %v517_v3 = vmul.f32 %v516_v57, %v1365_v60  ;;  %v524_v4 = vstv %s1739_s2  ;;  %v527_v5 = vstv %s1740_s7  ;;  %s1752_s2 = sld [smem:[#allocation28_spill]]  ;;  %s1753_s7 = sld [smem:[#allocation40_spill]] }
  0xe7   : >> { %v530_v6 = vstv %s1741_s14  ;;  %v498_v7 = vadd.f32 %v497_v44, %v495_v63  ;;  %v512_v8 = vadd.f32 %v511_v55, %v509_v0  ;;  %v525_v9 = vmul.f32 %v524_v4, %v1352_v49  ;;  %s1754_s14 = sld [smem:[#allocation52_spill]] }
  0xe8   : >> { %v528_v10 = vmul.f32 %v527_v5, %v1355_v52  ;;  %v1461_v11 = vpop.eup %927  ;;  %931 = vtanh.f32 %v480_v58  ;;  %v519_v12 = vstv %s1742_s15  ;;  %v531_v13 = vmul.f32 %v530_v6, %v1357_v53  ;;  %s1755_s15 = sld [smem:[#allocation64_spill]] }
  0xe9   : >> { %v533_v14 = vstv %s1743_s17  ;;  %v500_v15 = vadd.f32 %v499_v59, %v498_v7  ;;  %v515_v16 = vadd.f32 %v514_v1, %v512_v8  ;;  %v526_v17 = vadd.f32 %v525_v9, %v523_v2  ;;  %s1756_s17 = sld [smem:[#allocation76_spill]] }
  0xea   : >> { %v536_v18 = vstv %s1744_s1  ;;  %v542_v19 = vstv %s1745_s16  ;;  %v544_v20 = vstv %s1746_s3  ;;  %v547_v21 = vstv %s1747_s4  ;;  %s1757_s1 = sld [smem:[#allocation99_spill]]  ;;  %s1758_s16 = sld [smem:[#allocation88_spill]] }
  0xeb   : >> { %v550_v22 = vstv %s1748_s5  ;;  %v518_v23 = vadd.f32 %v517_v3, %v515_v16  ;;  %v529_v24 = vadd.f32 %v528_v10, %v526_v17  ;;  %v534_v25 = vmul.f32 %v533_v14, %v1360_v56  ;;  %s1759_s3 = sld [smem:[#allocation29_spill]]  ;;  %s1760_s4 = sld [smem:[#allocation41_spill]] }
  0xec   : >> { %v543_v26 = vmul.f32 %v542_v19, %v1350_v48  ;;  %v539_v27 = vstv %s1749_s18  ;;  %v545_v28 = vmul.f32 %v544_v20, %v1352_v49  ;;  %v548_v29 = vmul.f32 %v547_v21, %v1355_v52  ;;  %s1761_s5 = sld [smem:[#allocation53_spill]]  ;;  %s1762_s18 = sld [smem:[#allocation65_spill]] }
  0xed   : >> { %v553_v30 = vstv %s1750_s9  ;;  %933 = vtanh.f32 %v500_v15  ;;  %v532_v31 = vadd.f32 %v531_v13, %v529_v24  ;;  %v537_v32 = vmul.f32 %v536_v18, %v1365_v60  ;;  %s1763_s9 = sld [smem:[#allocation77_spill]] }
  0xee   : >> { %v551_v33 = vmul.f32 %v550_v22, %v1357_v53  ;;  %v1479_v34 = vpop.eup %929  ;;  %v520_v35 = vadd.f32 %v519_v12, %v518_v23  ;;  %v546_v36 = vadd.f32 %v545_v28, %v543_v26  ;;  %v556_v37 = vstv %s1751_s8  ;;  %s1764_s8 = sld [smem:[#allocation89_spill]] }
  0xef   : >> { %v562_v38 = vstv %s1752_s2  ;;  %v535_v39 = vadd.f32 %v534_v25, %v532_v31  ;;  %v554_v40 = vmul.f32 %v553_v30, %v1360_v56  ;;  %v564_v42 = vstv %s1753_s7  ;;  %s1765_s2 = sld [smem:[#allocation100_spill]]  ;;  %s1766_s7 = sld [smem:[#allocation30_spill]] }
  0xf0   : >> { %v563_v41 = vmul.f32 %v562_v38, %v1350_v48  ;;  %v549_v43 = vadd.f32 %v548_v29, %v546_v36  ;;  %v565_v44 = vmul.f32 %v564_v42, %v1352_v49  ;;  %v567_v45 = vstv %s1754_s14  ;;  %s1767_s14 = sld [smem:[#allocation42_spill]] }
  0xf1   : >> { %v570_v46 = vstv %s1755_s15  ;;  %v538_v47 = vadd.f32 %v537_v32, %v535_v39  ;;  %v557_v51 = vmul.f32 %v556_v37, %v1365_v60  ;;  %v568_v54 = vmul.f32 %v567_v45, %v1355_v52  ;;  %s1768_s15 = sld [smem:[#allocation54_spill]] }
  0xf2   : >> { %v573_v55 = vstv %s1756_s17  ;;  %v1492_v57 = vpop.eup %931  ;;  %v552_v58 = vadd.f32 %v551_v33, %v549_v43  ;;  %v559_v59 = vstv %s1757_s1  ;;  %v566_v61 = vadd.f32 %v565_v44, %v563_v41  ;;  %s1769_s17 = sld [smem:[#allocation66_spill]]  ;;  %s1770_s1 = sld [smem:[#allocation78_spill]] }
  0xf3   : >> { %v571_v63 = vmul.f32 %v570_v46, %v1357_v53  ;;  %935 = vtanh.f32 %v520_v35  ;;  %v574_v0 = vmul.f32 %v573_v55, %v1360_v56  ;;  %v576_v1 = vstv %s1758_s16  ;;  %s1771_s16 = sld [smem:[#allocation101_spill]] }
  0xf4   : >> { %v582_v2 = vstv %s1759_s3  ;;  %v555_v3 = vadd.f32 %v554_v40, %v552_v58  ;;  %v569_v4 = vadd.f32 %v568_v54, %v566_v61  ;;  %v584_v6 = vstv %s1760_s4  ;;  %s1772_s3 = sld [smem:[#allocation90_spill]]  ;;  %s1773_s4 = sld [smem:[#allocation103_spill]] }
  0xf5   : >> { %v583_v5 = vmul.f32 %v582_v2, %v1350_v48  ;;  %v540_v7 = vadd.f32 %v539_v27, %v538_v47  ;;  %v585_v8 = vmul.f32 %v584_v6, %v1352_v49  ;;  %v587_v9 = vstv %s1761_s5  ;;  %s1774_s5 = sld [smem:[#allocation104_spill]] }
  0xf6   : >> { %v590_v10 = vstv %s1762_s18  ;;  %v558_v12 = vadd.f32 %v557_v51, %v555_v3  ;;  %v572_v13 = vadd.f32 %v571_v63, %v569_v4  ;;  %v577_v14 = vmul.f32 %v576_v1, %v1365_v60  ;;  %s1775_s18 = sld [smem:[#allocation105_spill]] }
  0xf7   : >> { %v588_v15 = vmul.f32 %v587_v9, %v1355_v52  ;;  %v934_v16 = vpop.eup %933  ;;  %v586_v17 = vadd.f32 %v585_v8, %v583_v5  ;;  %v591_v18 = vmul.f32 %v590_v10, %v1357_v53  ;;  %v593_v19 = vstv %s1763_s9  ;;  %s1776_s9 = sld [smem:[#allocation102_spill]] }
  0xf8   : >> { %v596_v20 = vstv %s1764_s8  ;;  %v560_v21 = vadd.f32 %v559_v59, %v558_v12  ;;  %v575_v22 = vadd.f32 %v574_v0, %v572_v13  ;;  %v579_v23 = vstv %s1765_s2  ;;  %s1777_s8 = sld [smem:[#allocation106_spill]]  ;;  %s1778_s2 = sld [smem:[#allocation107_spill]] }
  0xf9   : >> { %v594_v24 = vmul.f32 %v593_v19, %v1360_v56  ;;  %v589_v25 = vadd.f32 %v588_v15, %v586_v17  ;;  %v602_v26 = vstv %s1766_s7  ;;  %v604_v27 = vstv %s1767_s14  ;;  %s1779_s7 = sld [smem:[#allocation108_spill]]  ;;  %s1780_s14 = sld [smem:[#allocation16_spill]] }
  0xfa   : >> { %v607_v28 = vstv %s1768_s15  ;;  %v578_v29 = vadd.f32 %v577_v14, %v575_v22  ;;  %v597_v30 = vmul.f32 %v596_v20, %v1365_v60  ;;  %v603_v31 = vmul.f32 %v602_v26, %v1350_v48  ;;  %s1781_s15 = sshll.u32 %s996_s10, 3  ;;  %s327_s10 = sadd.s32 1, %s996_s10  }
  0xfb   : >> { %v605_v32 = vmul.f32 %v604_v27, %v1352_v49  ;;  %v592_v33 = vadd.f32 %v591_v18, %v589_v25  ;;  %v608_v35 = vmul.f32 %v607_v28, %v1355_v52  ;;  %v610_v36 = vstv %s1769_s17  ;;  %p324_p6 = scmp.ge.s32.totalorder %s327_s10, 2  }
  0xfc   : >> { %v613_v37 = vstv %s1770_s1  ;;  %937 = vtanh.f32 %v540_v7  ;;  %v599_v38 = vstv %s1771_s16  ;;  %v611_v40 = vmul.f32 %v610_v36, %v1357_v53 }
  0xfd   : >> { %v606_v39 = vadd.f32 %v605_v32, %v603_v31  ;;  %v936_v41 = vpop.eup %935  ;;  %v580_v42 = vadd.f32 %v579_v23, %v578_v29  ;;  %v595_v43 = vadd.f32 %v594_v24, %v592_v33  ;;  %v616_v44 = vstv %s1772_s3 }
  0xfe   : >> { %v622_v48 = vstv %s1773_s4  ;;  %939 = vtanh.f32 %v560_v21  ;;  %v614_v52 = vmul.f32 %v613_v37, %v1360_v56  ;;  %v624_v47 = vstv %s1774_s5 }
  0xff   : >> { %v609_v49 = vadd.f32 %v608_v35, %v606_v39  ;;  %v623_v45 = vmul.f32 %v1445_v50, %v622_v48  ;;  %v598_v46 = vadd.f32 %v597_v30, %v595_v43  ;;  %v627_v51 = vstv %s1775_s18  ;;  %s659_s17 = scalar_lea.vmem %s1780_s14, %s1781_s15 }
 0x100   : >> { %v630_v54 = vstv %s1300_s13  ;;  %v617_v53 = vmul.f32 %v616_v44, %v1365_v60  ;;  %v625_v58 = vmul.f32 %v1451_v62, %v624_v47  ;;  %v628_v59 = vmul.f32 %v1461_v11, %v627_v51 }
 0x101   : >> { %v612_v55 = vadd.f32 %v611_v40, %v609_v49  ;;  %941 = vtanh.f32 %v580_v42  ;;  %v600_v61 = vadd.f32 %v599_v38, %v598_v46  ;;  %v633_v56 = vstv %s1302_s12 }
 0x102   : >> { %v626_v50 = vadd.f32 %v625_v58, %v623_v45  ;;  %v631_v0 = vmul.f32 %v1479_v34, %v630_v54  ;;  %v619_v1 = vstv %s1776_s9  ;;  %v636_v2 = vstv %s1304_s19 }
 0x103   : >> { %v615_v63 = vadd.f32 %v614_v52, %v612_v55  ;;  %943 = vtanh.f32 %v600_v61  ;;  %v634_v60 = vmul.f32 %v1492_v57, %v633_v56  ;;  %v639_v62 = vstv %s1306_s21 }
 0x104   : >> { %v629_v4 = vadd.f32 %v628_v59, %v626_v50  ;;  %v637_v7 = vmul.f32 %v934_v16, %v636_v2  ;;  %v642_v8 = vstv %s1308_s11  ;;  %v640_v10 = vmul.f32 %v936_v41, %v639_v62 }
 0x105   : >> { %v618_v3 = vadd.f32 %v617_v53, %v615_v63  ;;  %v645_v12 = vstv %s1310_s6  ;;  %v648_v17 = vstv %s1312_s0  ;;  %v651_v20 = vstv %s1777_s8 }
 0x106   : >> { %v938_v5 = vpop.eup %937  ;;  %v632_v6 = vadd.f32 %v631_v0, %v629_v4  ;;  %v654_v24 = vstv %s1778_s2  ;;  %v657_v29 = vstv %s1779_s7 }
 0x107   : >> { %v620_v11 = vadd.f32 %v619_v1, %v618_v3  ;;  %v643_v14 = vmul.f32 %v938_v5, %v642_v8 }
 0x108   : >> { %v940_v9 = vpop.eup %939  ;;  %v635_v34 = vadd.f32 %v634_v60, %v632_v6 }
 0x109   : >> { %945 = vtanh.f32 %v620_v11  ;;  %v646_v18 = vmul.f32 %v940_v9, %v645_v12 }
 0x10a   : >> { %v638_v13 = vadd.f32 %v637_v7, %v635_v34 }
 0x10b   : >> { %v942_v15 = vpop.eup %941 }
 0x10c   : >> { %v641_v57 = vadd.f32 %v640_v10, %v638_v13  ;;  %v649_v16 = vmul.f32 %v942_v15, %v648_v17 }
 0x10d   : >> { %v944_v19 = vpop.eup %943 }
 0x10e   : >> { %v644_v21 = vadd.f32 %v643_v14, %v641_v57  ;;  %v652_v23 = vmul.f32 %v944_v19, %v651_v20 }
 0x110   : >> { %v647_v22 = vadd.f32 %v646_v18, %v644_v21 }
 0x112   : >> { %v650_v26 = vadd.f32 %v649_v16, %v647_v22 }
 0x113   : >> { %v946_v25 = vpop.eup %945 }
 0x114   : >> { %v655_v27 = vmul.f32 %v946_v25, %v654_v24  ;;  %v653_v28 = vadd.f32 %v652_v23, %v650_v26  ;;  %326 = sbr.rel (!%p324_p6) target bundleno = 179 (0xb3), region = 116 }
 0x116   : >> { %v656_v30 = vadd.f32 %v655_v27, %v653_v28 }
 0x118   : >> { %v658_v31 = vadd.f32 %v657_v29, %v656_v30 }
 0x11a   : >> { %660 = vst [vmem:[%s659_s17] sm:$0xff] %v658_v31 }
 0x11b PF: > { %s1782_s11 = sld [smem:[#allocation7_spill]]  ;;  %s1783_s9 = sld [smem:[#allocation6_spill]] }
 0x11c   : > { %s1784_s10 = sld [smem:[#allocation8_spill]] }
 0x121   : > { %p10_p7 = scmp.ge.s32.totalorder %s1782_s11, 4  }
 0x123   :  { %12 = sbr.rel (!%p10_p7) target bundleno = 6 (0x6), region = 127 }
 0x12a   :  { %683 = vsyncpa [#allocation3], 1 }
 0x12b   :  { %685 = vsyncpa [#allocation3 + $0x1], 1 }

</bundles_post_ra>
